<compile_context>
chip_gen: v5e
topology: v5e:2x2
jax: 0.10.0
libtpu: 0.0.40
codegen_flags: <defaults>
</compile_context>

<pallas_src>
import functools
import math

import jax
import jax.numpy as jnp
import numpy as np
from jax.experimental import pallas as pl
from jax.experimental.pallas import tpu as pltpu


def _gelu_tanh(x):
    # tanh-approximate GELU: 1 EUP op + ~6 VALU ops per element; error vs. the
    # exact erf GELU is ~3e-3 worst case, far inside the bf16-matmul noise floor.
    c = math.sqrt(2.0 / math.pi)
    return 0.5 * x * (1.0 + jnp.tanh(c * (x + 0.044715 * x * x * x)))


def _layer_norm(v, g, b, eps=1e-5):
    mu = jnp.mean(v, axis=-1, keepdims=True)
    var = jnp.mean((v - mu) ** 2, axis=-1, keepdims=True)
    return (v - mu) * jax.lax.rsqrt(var + eps) * g + b


def clip_layer_kernel(x_ref,
                      ln1_g_ref, ln1_b_ref,
                      wqkv_ref, bqkv_ref,
                      wo_ref, bo_ref,
                      ln2_g_ref, ln2_b_ref,
                      w1_ref, b1_ref, w2_ref, b2_ref,
                      out_ref,
                      qkv_ref, ctx_ref, ln2h_ref, acc_ref,
                      *, num_heads):
    c = pl.program_id(1)           # MLP hidden-chunk index ("arbitrary" axis)
    bf16 = jnp.bfloat16

    # ---- chunk 0: LN1 -> causal MHSA -> residual -> LN2; seed the MLP accumulator --
    @pl.when(c == 0)
    def _attention():
        x = x_ref[0]                               # (S, E) f32
        S, E = x.shape
        dh = E // num_heads

        h = _layer_norm(x, ln1_g_ref[...], ln1_b_ref[...])
        hb = h.astype(bf16)

        # One wide (S,E)@(E,3E) projection keeps the MXU fully occupied (N=3E).
        # 1/sqrt(dh) and the q-bias were folded into wqkv/bqkv in the wrapper.
        qkv = (jnp.dot(hb, wqkv_ref[...], preferred_element_type=jnp.float32)
               + bqkv_ref[...])
        qkv_ref[...] = qkv.astype(bf16)            # bf16 VMEM staging for per-head use

        row = jax.lax.broadcasted_iota(jnp.int32, (S, S), 0)
        col = jax.lax.broadcasted_iota(jnp.int32, (S, S), 1)
        causal_ok = col <= row                     # padded keys are always masked

        # Per-head scores / softmax / PV.  Contexts land at their lane offset in a
        # (S, E) bf16 scratch so the output projection below is ONE (S,E)@(E,E)
        # matmul (no per-head K=dh matmuls, no per-head (S,E) accumulator RMW).
        for hh in range(num_heads):                # static, small loop over heads
            lo = hh * dh
            qh = qkv_ref[:, lo:lo + dh]
            kh = qkv_ref[:, E + lo:E + lo + dh]
            vh = qkv_ref[:, 2 * E + lo:2 * E + lo + dh]

            sc = jax.lax.dot_general(              # q @ k^T without explicit transpose
                qh, kh, (((1,), (1,)), ((), ())),
                preferred_element_type=jnp.float32)
            sc = jnp.where(causal_ok, sc, -1e30)   # large-finite mask (robust vs -inf)
            sc = sc - jnp.max(sc, axis=-1, keepdims=True)
            p = jnp.exp(sc)
            l = jnp.sum(p, axis=-1, keepdims=True)

            ctx = jnp.dot(p.astype(bf16), vh, preferred_element_type=jnp.float32)
            # Normalise the (S, dh) context, not the (S, S) score tile.
            ctx = ctx * pl.reciprocal(l, approx=True)
            ctx_ref[:, lo:lo + dh] = ctx.astype(bf16)

        attn = (x + bo_ref[...]
                + jnp.dot(ctx_ref[...], wo_ref[...],
                          preferred_element_type=jnp.float32))   # single wide out-proj
        x1 = attn                                   # == x + attention(LN1(x))
        ln2h_ref[...] = _layer_norm(x1, ln2_g_ref[...], ln2_b_ref[...]).astype(bf16)
        acc_ref[...] = x1 + b2_ref[...]             # seed: residual 2 + final MLP bias

    # ---- every chunk: acc += GELU(LN2(x1) @ w1[:, chunk]) @ w2[chunk, :] -----------
    g = jnp.dot(ln2h_ref[...], w1_ref[0], preferred_element_type=jnp.float32) + b1_ref[0]
    g = _gelu_tanh(g)                               # f32, (S, chunk)
    acc_ref[...] += jnp.dot(g.astype(bf16), w2_ref[0], preferred_element_type=jnp.float32)

    @pl.when(c == pl.num_programs(1) - 1)
    def _finalize():
        out_ref[0] = acc_ref[...].astype(out_ref.dtype)


def _tpu_vmem_capacity_bytes():
    try:
        return int(pltpu.get_tpu_info().vmem_capacity_bytes)
    except Exception:
        return 64 * 1024 * 1024        # conservative (v7x-sized) fallback


def _pick_hidden_chunk(h4, target):
    """Largest multiple of 128 <= target that divides 4E (else use the full 4E)."""
    if h4 <= target:
        return h4
    cand = (target // 128) * 128
    while cand >= 128:
        if h4 % cand == 0:
            return cand
        cand -= 128
    return h4


def clip_layer(x, params, num_heads, *, hidden_chunk=None):
    B, S, E = x.shape
    assert E % num_heads == 0
    dh = E // num_heads
    H4 = 4 * E
    bf16 = jnp.bfloat16

    # Derive VMEM budget / MLP chunk width from the part's VMEM capacity.
    vmem_cap = _tpu_vmem_capacity_bytes()
    if hidden_chunk is None:
        hidden_chunk = 2048 if vmem_cap >= 96 * 1024 * 1024 else 1024
    vmem_limit = min(vmem_cap * 5 // 8, 96 * 1024 * 1024)

    # Pad sequence length to a bf16-packing multiple (16); causal mask keeps padded
    # keys inert and padded query rows are sliced off below.
    S_pad = ((S + 15) // 16) * 16
    if S_pad != S:
        x = jnp.pad(x, ((0, 0), (0, S_pad - S), (0, 0)))

    CH = _pick_hidden_chunk(H4, hidden_chunk)       # MLP hidden chunk width
    NCH = H4 // CH

    # --- one-off host-side repacking: bf16 matmul operands; fold 1/sqrt(dh) and the
    # --- q-bias scaling into the packed QKV weights; hidden-chunked MLP weights.
    scale = 1.0 / math.sqrt(dh)
    col_scale = jnp.concatenate(
        [jnp.full((1, E), scale, jnp.float32), jnp.ones((1, 2 * E), jnp.float32)],
        axis=1)
    wqkv = (params["wqkv"].astype(jnp.float32) * col_scale).astype(bf16)    # (E, 3E)
    bqkv = params["bqkv"].reshape(1, 3 * E).astype(jnp.float32) * col_scale  # (1, 3E)
    wo = params["wo"].astype(bf16)                                          # (E, E)
    bo = params["bo"].reshape(1, E)
    ln1_g, ln1_b = params["ln1_g"], params["ln1_b"]
    ln2_g, ln2_b = params["ln2_g"], params["ln2_b"]
    w1 = params["w1"].reshape(E, NCH, CH).transpose(1, 0, 2).astype(bf16)   # (NCH, E, CH)
    b1 = params["b1"].reshape(1, NCH, CH).transpose(1, 0, 2)                # (NCH, 1, CH)
    w2 = params["w2"].reshape(NCH, CH, E).astype(bf16)                      # (NCH, CH, E)
    b2 = params["b2"].reshape(1, E)

    def const_spec(a):
        nd = a.ndim
        return pl.BlockSpec(a.shape, lambda b, c, _nd=nd: (0,) * _nd)

    io_spec = pl.BlockSpec((1, S_pad, E), lambda b, c: (b, 0, 0))
    kernel = functools.partial(clip_layer_kernel, num_heads=num_heads)

    out = pl.pallas_call(
        kernel,
        out_shape=jax.ShapeDtypeStruct((B, S_pad, E), x.dtype),
        grid=(B, NCH),
        in_specs=[io_spec,
                  const_spec(ln1_g), const_spec(ln1_b),
                  const_spec(wqkv), const_spec(bqkv),
                  const_spec(wo), const_spec(bo),
                  const_spec(ln2_g), const_spec(ln2_b),
                  pl.BlockSpec((1, E, CH), lambda b, c: (c, 0, 0)),   # w1 chunk
                  pl.BlockSpec((1, 1, CH), lambda b, c: (c, 0, 0)),   # b1 chunk
                  pl.BlockSpec((1, CH, E), lambda b, c: (c, 0, 0)),   # w2 chunk
                  const_spec(b2)],
        out_specs=io_spec,
        scratch_shapes=[pltpu.VMEM((S_pad, 3 * E), jnp.bfloat16),   # QKV staging (bf16)
                        pltpu.VMEM((S_pad, E), jnp.bfloat16),       # per-head contexts
                        pltpu.VMEM((S_pad, E), jnp.bfloat16),       # LN2(x1), bf16 MXU in
                        pltpu.VMEM((S_pad, E), jnp.float32)],       # f32 MLP accumulator
        compiler_params=pltpu.CompilerParams(
            dimension_semantics=("parallel", "arbitrary"),
            vmem_limit_bytes=int(vmem_limit)),
    )(x, ln1_g, ln1_b, wqkv, bqkv, wo, bo, ln2_g, ln2_b, w1, b1, w2, b2)

    return out[:, :S, :] if S_pad != S else out


def clip_layer_ref(x, p, num_heads):
    """Pure-JAX fp32 reference mirroring the PyTorch forward (exact-erf GELU)."""
    def ln(v, g, b, eps=1e-5):
        mu = v.mean(-1, keepdims=True)
        var = ((v - mu) ** 2).mean(-1, keepdims=True)
        return (v - mu) / jnp.sqrt(var + eps) * g + b

    B, S, E = x.shape
    dh = E // num_heads
    res = x
    h = ln(x, p["ln1_g"], p["ln1_b"])
    qkv = h @ p["wqkv"] + p["bqkv"]
    q, k, v = jnp.split(qkv, 3, axis=-1)
    q = q.reshape(B, S, num_heads, dh).transpose(0, 2, 1, 3)
    k = k.reshape(B, S, num_heads, dh).transpose(0, 2, 1, 3)
    v = v.reshape(B, S, num_heads, dh).transpose(0, 2, 1, 3)
    sc = jnp.einsum("bhqd,bhkd->bhqk", q, k)
    mask = jnp.tril(jnp.ones((S, S), bool))
    sc = jnp.where(mask, sc, -jnp.inf) / jnp.sqrt(dh)
    w = jax.nn.softmax(sc, axis=-1)
    o = jnp.einsum("bhqk,bhkd->bhqd", w, v).transpose(0, 2, 1, 3).reshape(B, S, E)
    o = o @ p["wo"] + p["bo"]
    x1 = o + res
    h2 = ln(x1, p["ln2_g"], p["ln2_b"])
    h2 = h2 @ p["w1"] + p["b1"]
    h2 = jax.nn.gelu(h2, approximate=False)
    h2 = h2 @ p["w2"] + p["b2"]
    return h2 + x1


def make_params(key, num_embeddings):
    E = num_embeddings
    ks = jax.random.split(key, 8)
    f32 = jnp.float32
    return {
        "ln1_g": jnp.ones((1, E), f32),
        "ln1_b": jnp.zeros((1, E), f32),
        "wqkv": 0.05 * jax.random.normal(ks[0], (E, 3 * E), f32),
        "bqkv": 0.01 * jax.random.normal(ks[1], (1, 3 * E), f32),
        "wo":   0.05 * jax.random.normal(ks[2], (E, E), f32),
        "bo":   0.01 * jax.random.normal(ks[3], (1, E), f32),
        "ln2_g": jnp.ones((1, E), f32),
        "ln2_b": jnp.zeros((1, E), f32),
        "w1":   0.05 * jax.random.normal(ks[4], (E, 4 * E), f32),
        "b1":   0.01 * jax.random.normal(ks[5], (1, 4 * E), f32),
        "w2":   0.05 * jax.random.normal(ks[6], (4 * E, E), f32),
        "b2":   0.01 * jax.random.normal(ks[7], (1, E), f32),
    }


if __name__ == "__main__":
    B, S, E, H = 2, 8, 32, 4          # batch, seq, num_embeddings, num_heads
    key = jax.random.PRNGKey(0)
    kx, kp = jax.random.split(key)
    x = jax.random.normal(kx, (B, S, E), jnp.float32)
    params = make_params(kp, E)

    out = jax.block_until_ready(clip_layer(x, params, H))

    ref = clip_layer_ref(x, params, H)
    # bf16 MXU operands (f32 accumulation) + tanh-GELU bound the kernel-vs-fp32-ref
    # error well inside 3e-2 at these magnitudes.
    np.testing.assert_allclose(np.asarray(out), np.asarray(ref), rtol=3e-2, atol=3e-2)
    print("KERNEL_OK")
</pallas_src>

<mosaic_0001>
module attributes {stable_mosaic.version = 11 : i64} {
  func.func @clip_layer_kernel(%arg0: i32, %arg1: i32, %arg2: memref<1x16x32xf32, #tpu.memory_space<vmem>>, %arg3: memref<1x32xf32, #tpu.memory_space<vmem>>, %arg4: memref<1x32xf32, #tpu.memory_space<vmem>>, %arg5: memref<32x96xbf16, #tpu.memory_space<vmem>>, %arg6: memref<1x96xf32, #tpu.memory_space<vmem>>, %arg7: memref<32x32xbf16, #tpu.memory_space<vmem>>, %arg8: memref<1x32xf32, #tpu.memory_space<vmem>>, %arg9: memref<1x32xf32, #tpu.memory_space<vmem>>, %arg10: memref<1x32xf32, #tpu.memory_space<vmem>>, %arg11: memref<1x32x128xbf16, #tpu.memory_space<vmem>>, %arg12: memref<1x1x128xf32, #tpu.memory_space<vmem>>, %arg13: memref<1x128x32xbf16, #tpu.memory_space<vmem>>, %arg14: memref<1x32xf32, #tpu.memory_space<vmem>>, %arg15: memref<1x16x32xf32, #tpu.memory_space<vmem>>, %arg16: memref<16x96xbf16, #tpu.memory_space<vmem>>, %arg17: memref<16x32xbf16, #tpu.memory_space<vmem>>, %arg18: memref<16x32xbf16, #tpu.memory_space<vmem>>, %arg19: memref<16x32xf32, #tpu.memory_space<vmem>>) attributes {dimension_semantics = [#tpu.dimension_semantics<parallel>, #tpu.dimension_semantics<arbitrary>], iteration_bounds = array<i64: 2, 1>, scalar_prefetch = 0 : i64, scratch_operands = 4 : i64, tpu.core_type = #tpu.core_type<tc>, window_params = [{transform_indices = @transform_0, window_bounds = array<i64: 1, 16, 32>}, {pipeline_mode = #tpu.pipeline_mode<synchronous>, transform_indices = @transform_1, window_bounds = array<i64: 1, 32>}, {pipeline_mode = #tpu.pipeline_mode<synchronous>, transform_indices = @transform_2, window_bounds = array<i64: 1, 32>}, {pipeline_mode = #tpu.pipeline_mode<synchronous>, transform_indices = @transform_3, window_bounds = array<i64: 32, 96>}, {pipeline_mode = #tpu.pipeline_mode<synchronous>, transform_indices = @transform_4, window_bounds = array<i64: 1, 96>}, {pipeline_mode = #tpu.pipeline_mode<synchronous>, transform_indices = @transform_5, window_bounds = array<i64: 32, 32>}, {pipeline_mode = #tpu.pipeline_mode<synchronous>, transform_indices = @transform_6, window_bounds = array<i64: 1, 32>}, {pipeline_mode = #tpu.pipeline_mode<synchronous>, transform_indices = @transform_7, window_bounds = array<i64: 1, 32>}, {pipeline_mode = #tpu.pipeline_mode<synchronous>, transform_indices = @transform_8, window_bounds = array<i64: 1, 32>}, {transform_indices = @transform_9, window_bounds = array<i64: 1, 32, 128>}, {transform_indices = @transform_10, window_bounds = array<i64: 1, 1, 128>}, {transform_indices = @transform_11, window_bounds = array<i64: 1, 128, 32>}, {pipeline_mode = #tpu.pipeline_mode<synchronous>, transform_indices = @transform_12, window_bounds = array<i64: 1, 32>}, {transform_indices = @transform_13, window_bounds = array<i64: 1, 16, 32>}]} {
    %c0_i32 = arith.constant 0 : i32
    %0 = arith.cmpi eq, %arg1, %c0_i32 : i32
    %1 = arith.extui %0 : i1 to i32
    %c0_i32_0 = arith.constant 0 : i32
    %2 = arith.cmpi ne, %1, %c0_i32_0 : i32
    scf.if %2 {
      %c0_22 = arith.constant 0 : index
      %c0_23 = arith.constant 0 : index
      %c0_24 = arith.constant 0 : index
      %34 = vector.load %arg2[%c0_22, %c0_23, %c0_24] : memref<1x16x32xf32, #tpu.memory_space<vmem>>, vector<1x16x32xf32>
      %35 = vector.shape_cast %34 : vector<1x16x32xf32> to vector<16x32xf32>
      %c0_25 = arith.constant 0 : index
      %c0_26 = arith.constant 0 : index
      %36 = vector.load %arg3[%c0_25, %c0_26] : memref<1x32xf32, #tpu.memory_space<vmem>>, vector<1x32xf32>
      %c0_27 = arith.constant 0 : index
      %c0_28 = arith.constant 0 : index
      %37 = vector.load %arg4[%c0_27, %c0_28] : memref<1x32xf32, #tpu.memory_space<vmem>>, vector<1x32xf32>
      %cst_29 = arith.constant dense<0.000000e+00> : vector<16xf32>
      %38 = vector.multi_reduction <add>, %35, %cst_29 [1] : vector<16x32xf32> to vector<16xf32>
      %39 = vector.shape_cast %38 : vector<16xf32> to vector<16x1xf32>
      %cst_30 = arith.constant 3.200000e+01 : f32
      %40 = vector.broadcast %cst_30 : f32 to vector<16x1xf32>
      %41 = arith.divf %39, %40 : vector<16x1xf32>
      %42 = vector.broadcast %41 : vector<16x1xf32> to vector<16x32xf32>
      %43 = arith.subf %35, %42 : vector<16x32xf32>
      %44 = arith.mulf %43, %43 : vector<16x32xf32>
      %cst_31 = arith.constant dense<0.000000e+00> : vector<16xf32>
      %45 = vector.multi_reduction <add>, %44, %cst_31 [1] : vector<16x32xf32> to vector<16xf32>
      %46 = vector.shape_cast %45 : vector<16xf32> to vector<16x1xf32>
      %cst_32 = arith.constant 3.200000e+01 : f32
      %47 = vector.broadcast %cst_32 : f32 to vector<16x1xf32>
      %48 = arith.divf %46, %47 : vector<16x1xf32>
      %49 = vector.broadcast %41 : vector<16x1xf32> to vector<16x32xf32>
      %50 = arith.subf %35, %49 : vector<16x32xf32>
      %cst_33 = arith.constant 9.99999974E-6 : f32
      %51 = vector.broadcast %cst_33 : f32 to vector<16x1xf32>
      %52 = arith.addf %48, %51 : vector<16x1xf32>
      %53 = math.rsqrt %52 : vector<16x1xf32>
      %54 = vector.broadcast %53 : vector<16x1xf32> to vector<16x32xf32>
      %55 = arith.mulf %50, %54 : vector<16x32xf32>
      %56 = vector.broadcast %36 : vector<1x32xf32> to vector<16x32xf32>
      %57 = arith.mulf %55, %56 : vector<16x32xf32>
      %58 = vector.broadcast %37 : vector<1x32xf32> to vector<16x32xf32>
      %59 = arith.addf %57, %58 : vector<16x32xf32>
      %60 = arith.truncf %59 : vector<16x32xf32> to vector<16x32xbf16>
      %c0_34 = arith.constant 0 : index
      %c0_35 = arith.constant 0 : index
      %61 = vector.load %arg5[%c0_34, %c0_35] : memref<32x96xbf16, #tpu.memory_space<vmem>>, vector<32x96xbf16>
      %cst_36 = arith.constant dense<0.000000e+00> : vector<16x96xf32>
      %62 = tpu.matmul %60, %61, %cst_36 {dimension_numbers = #tpu.dot_dimension_numbers<[1], [0], [0], [1], [0, 0, 1, 1], [], []>} : vector<16x32xbf16>, vector<32x96xbf16>, vector<16x96xf32> -> vector<16x96xf32>
      %c0_37 = arith.constant 0 : index
      %c0_38 = arith.constant 0 : index
      %63 = vector.load %arg6[%c0_37, %c0_38] : memref<1x96xf32, #tpu.memory_space<vmem>>, vector<1x96xf32>
      %64 = vector.broadcast %63 : vector<1x96xf32> to vector<16x96xf32>
      %65 = arith.addf %62, %64 : vector<16x96xf32>
      %66 = arith.truncf %65 : vector<16x96xf32> to vector<16x96xbf16>
      %c0_39 = arith.constant 0 : index
      %c0_40 = arith.constant 0 : index
      %67 = vector.load %arg16[%c0_39, %c0_40] : memref<16x96xbf16, #tpu.memory_space<vmem>>, vector<16x96xbf16>
      tpu.vector_store %arg16[%c0_39, %c0_40], %66 {strides = array<i32>} : memref<16x96xbf16, #tpu.memory_space<vmem>>, vector<16x96xbf16>,
      %68 = tpu.iota {dimensions = array<i32: 0>} : vector<16x16xi32>
      %69 = tpu.iota {dimensions = array<i32: 1>} : vector<16x16xi32>
      %70 = arith.cmpi sle, %69, %68 : vector<16x16xi32>
      %c0_41 = arith.constant 0 : index
      %c0_42 = arith.constant 0 : index
      %71 = vector.load %arg16[%c0_41, %c0_42] : memref<16x96xbf16, #tpu.memory_space<vmem>>, vector<16x8xbf16>
      %c0_43 = arith.constant 0 : index
      %c32 = arith.constant 32 : index
      %72 = vector.load %arg16[%c0_43, %c32] : memref<16x96xbf16, #tpu.memory_space<vmem>>, vector<16x8xbf16>
      %c0_44 = arith.constant 0 : index
      %c64 = arith.constant 64 : index
      %73 = vector.load %arg16[%c0_44, %c64] : memref<16x96xbf16, #tpu.memory_space<vmem>>, vector<16x8xbf16>
      %cst_45 = arith.constant dense<0.000000e+00> : vector<16x16xf32>
      %74 = tpu.matmul %71, %72, %cst_45 {dimension_numbers = #tpu.dot_dimension_numbers<[1], [1], [0], [0], [0, 0, 1, 0], [], []>} : vector<16x8xbf16>, vector<16x8xbf16>, vector<16x16xf32> -> vector<16x16xf32>
      %cst_46 = arith.constant -1.000000e+30 : f32
      %75 = vector.broadcast %cst_46 : f32 to vector<16x16xf32>
      %76 = arith.select %70, %74, %75 : vector<16x16xi1>, vector<16x16xf32>
      %cst_47 = arith.constant dense<0xFF800000> : vector<16xf32>
      %77 = vector.multi_reduction <maximumf>, %76, %cst_47 [1] : vector<16x16xf32> to vector<16xf32>
      %78 = vector.shape_cast %77 : vector<16xf32> to vector<16x1xf32>
      %79 = vector.broadcast %78 : vector<16x1xf32> to vector<16x16xf32>
      %80 = arith.subf %76, %79 : vector<16x16xf32>
      %81 = math.exp %80 : vector<16x16xf32>
      %cst_48 = arith.constant dense<0.000000e+00> : vector<16xf32>
      %82 = vector.multi_reduction <add>, %81, %cst_48 [1] : vector<16x16xf32> to vector<16xf32>
      %83 = vector.shape_cast %82 : vector<16xf32> to vector<16x1xf32>
      %84 = arith.truncf %81 : vector<16x16xf32> to vector<16x16xbf16>
      %cst_49 = arith.constant dense<0.000000e+00> : vector<16x8xf32>
      %85 = tpu.matmul %84, %73, %cst_49 {dimension_numbers = #tpu.dot_dimension_numbers<[1], [0], [0], [1], [0, 0, 1, 1], [], []>} : vector<16x16xbf16>, vector<16x8xbf16>, vector<16x8xf32> -> vector<16x8xf32>
      %86 = tpu.reciprocal %83 {approx = true} : vector<16x1xf32> -> vector<16x1xf32>
      %87 = vector.broadcast %86 : vector<16x1xf32> to vector<16x8xf32>
      %88 = arith.mulf %85, %87 : vector<16x8xf32>
      %89 = arith.truncf %88 : vector<16x8xf32> to vector<16x8xbf16>
      %c0_50 = arith.constant 0 : index
      %c0_51 = arith.constant 0 : index
      %90 = vector.load %arg17[%c0_50, %c0_51] : memref<16x32xbf16, #tpu.memory_space<vmem>>, vector<16x8xbf16>
      tpu.vector_store %arg17[%c0_50, %c0_51], %89 {strides = array<i32>} : memref<16x32xbf16, #tpu.memory_space<vmem>>, vector<16x8xbf16>,
      %c0_52 = arith.constant 0 : index
      %c8 = arith.constant 8 : index
      %91 = vector.load %arg16[%c0_52, %c8] : memref<16x96xbf16, #tpu.memory_space<vmem>>, vector<16x8xbf16>
      %c0_53 = arith.constant 0 : index
      %c40 = arith.constant 40 : index
      %92 = vector.load %arg16[%c0_53, %c40] : memref<16x96xbf16, #tpu.memory_space<vmem>>, vector<16x8xbf16>
      %c0_54 = arith.constant 0 : index
      %c72 = arith.constant 72 : index
      %93 = vector.load %arg16[%c0_54, %c72] : memref<16x96xbf16, #tpu.memory_space<vmem>>, vector<16x8xbf16>
      %cst_55 = arith.constant dense<0.000000e+00> : vector<16x16xf32>
      %94 = tpu.matmul %91, %92, %cst_55 {dimension_numbers = #tpu.dot_dimension_numbers<[1], [1], [0], [0], [0, 0, 1, 0], [], []>} : vector<16x8xbf16>, vector<16x8xbf16>, vector<16x16xf32> -> vector<16x16xf32>
      %cst_56 = arith.constant -1.000000e+30 : f32
      %95 = vector.broadcast %cst_56 : f32 to vector<16x16xf32>
      %96 = arith.select %70, %94, %95 : vector<16x16xi1>, vector<16x16xf32>
      %cst_57 = arith.constant dense<0xFF800000> : vector<16xf32>
      %97 = vector.multi_reduction <maximumf>, %96, %cst_57 [1] : vector<16x16xf32> to vector<16xf32>
      %98 = vector.shape_cast %97 : vector<16xf32> to vector<16x1xf32>
      %99 = vector.broadcast %98 : vector<16x1xf32> to vector<16x16xf32>
      %100 = arith.subf %96, %99 : vector<16x16xf32>
      %101 = math.exp %100 : vector<16x16xf32>
      %cst_58 = arith.constant dense<0.000000e+00> : vector<16xf32>
      %102 = vector.multi_reduction <add>, %101, %cst_58 [1] : vector<16x16xf32> to vector<16xf32>
      %103 = vector.shape_cast %102 : vector<16xf32> to vector<16x1xf32>
      %104 = arith.truncf %101 : vector<16x16xf32> to vector<16x16xbf16>
      %cst_59 = arith.constant dense<0.000000e+00> : vector<16x8xf32>
      %105 = tpu.matmul %104, %93, %cst_59 {dimension_numbers = #tpu.dot_dimension_numbers<[1], [0], [0], [1], [0, 0, 1, 1], [], []>} : vector<16x16xbf16>, vector<16x8xbf16>, vector<16x8xf32> -> vector<16x8xf32>
      %106 = tpu.reciprocal %103 {approx = true} : vector<16x1xf32> -> vector<16x1xf32>
      %107 = vector.broadcast %106 : vector<16x1xf32> to vector<16x8xf32>
      %108 = arith.mulf %105, %107 : vector<16x8xf32>
      %109 = arith.truncf %108 : vector<16x8xf32> to vector<16x8xbf16>
      %c0_60 = arith.constant 0 : index
      %c8_61 = arith.constant 8 : index
      %110 = vector.load %arg17[%c0_60, %c8_61] : memref<16x32xbf16, #tpu.memory_space<vmem>>, vector<16x8xbf16>
      tpu.vector_store %arg17[%c0_60, %c8_61], %109 {strides = array<i32>} : memref<16x32xbf16, #tpu.memory_space<vmem>>, vector<16x8xbf16>,
      %c0_62 = arith.constant 0 : index
      %c16 = arith.constant 16 : index
      %111 = vector.load %arg16[%c0_62, %c16] : memref<16x96xbf16, #tpu.memory_space<vmem>>, vector<16x8xbf16>
      %c0_63 = arith.constant 0 : index
      %c48 = arith.constant 48 : index
      %112 = vector.load %arg16[%c0_63, %c48] : memref<16x96xbf16, #tpu.memory_space<vmem>>, vector<16x8xbf16>
      %c0_64 = arith.constant 0 : index
      %c80 = arith.constant 80 : index
      %113 = vector.load %arg16[%c0_64, %c80] : memref<16x96xbf16, #tpu.memory_space<vmem>>, vector<16x8xbf16>
      %cst_65 = arith.constant dense<0.000000e+00> : vector<16x16xf32>
      %114 = tpu.matmul %111, %112, %cst_65 {dimension_numbers = #tpu.dot_dimension_numbers<[1], [1], [0], [0], [0, 0, 1, 0], [], []>} : vector<16x8xbf16>, vector<16x8xbf16>, vector<16x16xf32> -> vector<16x16xf32>
      %cst_66 = arith.constant -1.000000e+30 : f32
      %115 = vector.broadcast %cst_66 : f32 to vector<16x16xf32>
      %116 = arith.select %70, %114, %115 : vector<16x16xi1>, vector<16x16xf32>
      %cst_67 = arith.constant dense<0xFF800000> : vector<16xf32>
      %117 = vector.multi_reduction <maximumf>, %116, %cst_67 [1] : vector<16x16xf32> to vector<16xf32>
      %118 = vector.shape_cast %117 : vector<16xf32> to vector<16x1xf32>
      %119 = vector.broadcast %118 : vector<16x1xf32> to vector<16x16xf32>
      %120 = arith.subf %116, %119 : vector<16x16xf32>
      %121 = math.exp %120 : vector<16x16xf32>
      %cst_68 = arith.constant dense<0.000000e+00> : vector<16xf32>
      %122 = vector.multi_reduction <add>, %121, %cst_68 [1] : vector<16x16xf32> to vector<16xf32>
      %123 = vector.shape_cast %122 : vector<16xf32> to vector<16x1xf32>
      %124 = arith.truncf %121 : vector<16x16xf32> to vector<16x16xbf16>
      %cst_69 = arith.constant dense<0.000000e+00> : vector<16x8xf32>
      %125 = tpu.matmul %124, %113, %cst_69 {dimension_numbers = #tpu.dot_dimension_numbers<[1], [0], [0], [1], [0, 0, 1, 1], [], []>} : vector<16x16xbf16>, vector<16x8xbf16>, vector<16x8xf32> -> vector<16x8xf32>
      %126 = tpu.reciprocal %123 {approx = true} : vector<16x1xf32> -> vector<16x1xf32>
      %127 = vector.broadcast %126 : vector<16x1xf32> to vector<16x8xf32>
      %128 = arith.mulf %125, %127 : vector<16x8xf32>
      %129 = arith.truncf %128 : vector<16x8xf32> to vector<16x8xbf16>
      %c0_70 = arith.constant 0 : index
      %c16_71 = arith.constant 16 : index
      %130 = vector.load %arg17[%c0_70, %c16_71] : memref<16x32xbf16, #tpu.memory_space<vmem>>, vector<16x8xbf16>
      tpu.vector_store %arg17[%c0_70, %c16_71], %129 {strides = array<i32>} : memref<16x32xbf16, #tpu.memory_space<vmem>>, vector<16x8xbf16>,
      %c0_72 = arith.constant 0 : index
      %c24 = arith.constant 24 : index
      %131 = vector.load %arg16[%c0_72, %c24] : memref<16x96xbf16, #tpu.memory_space<vmem>>, vector<16x8xbf16>
      %c0_73 = arith.constant 0 : index
      %c56 = arith.constant 56 : index
      %132 = vector.load %arg16[%c0_73, %c56] : memref<16x96xbf16, #tpu.memory_space<vmem>>, vector<16x8xbf16>
      %c0_74 = arith.constant 0 : index
      %c88 = arith.constant 88 : index
      %133 = vector.load %arg16[%c0_74, %c88] : memref<16x96xbf16, #tpu.memory_space<vmem>>, vector<16x8xbf16>
      %cst_75 = arith.constant dense<0.000000e+00> : vector<16x16xf32>
      %134 = tpu.matmul %131, %132, %cst_75 {dimension_numbers = #tpu.dot_dimension_numbers<[1], [1], [0], [0], [0, 0, 1, 0], [], []>} : vector<16x8xbf16>, vector<16x8xbf16>, vector<16x16xf32> -> vector<16x16xf32>
      %cst_76 = arith.constant -1.000000e+30 : f32
      %135 = vector.broadcast %cst_76 : f32 to vector<16x16xf32>
      %136 = arith.select %70, %134, %135 : vector<16x16xi1>, vector<16x16xf32>
      %cst_77 = arith.constant dense<0xFF800000> : vector<16xf32>
      %137 = vector.multi_reduction <maximumf>, %136, %cst_77 [1] : vector<16x16xf32> to vector<16xf32>
      %138 = vector.shape_cast %137 : vector<16xf32> to vector<16x1xf32>
      %139 = vector.broadcast %138 : vector<16x1xf32> to vector<16x16xf32>
      %140 = arith.subf %136, %139 : vector<16x16xf32>
      %141 = math.exp %140 : vector<16x16xf32>
      %cst_78 = arith.constant dense<0.000000e+00> : vector<16xf32>
      %142 = vector.multi_reduction <add>, %141, %cst_78 [1] : vector<16x16xf32> to vector<16xf32>
      %143 = vector.shape_cast %142 : vector<16xf32> to vector<16x1xf32>
      %144 = arith.truncf %141 : vector<16x16xf32> to vector<16x16xbf16>
      %cst_79 = arith.constant dense<0.000000e+00> : vector<16x8xf32>
      %145 = tpu.matmul %144, %133, %cst_79 {dimension_numbers = #tpu.dot_dimension_numbers<[1], [0], [0], [1], [0, 0, 1, 1], [], []>} : vector<16x16xbf16>, vector<16x8xbf16>, vector<16x8xf32> -> vector<16x8xf32>
      %146 = tpu.reciprocal %143 {approx = true} : vector<16x1xf32> -> vector<16x1xf32>
      %147 = vector.broadcast %146 : vector<16x1xf32> to vector<16x8xf32>
      %148 = arith.mulf %145, %147 : vector<16x8xf32>
      %149 = arith.truncf %148 : vector<16x8xf32> to vector<16x8xbf16>
      %c0_80 = arith.constant 0 : index
      %c24_81 = arith.constant 24 : index
      %150 = vector.load %arg17[%c0_80, %c24_81] : memref<16x32xbf16, #tpu.memory_space<vmem>>, vector<16x8xbf16>
      tpu.vector_store %arg17[%c0_80, %c24_81], %149 {strides = array<i32>} : memref<16x32xbf16, #tpu.memory_space<vmem>>, vector<16x8xbf16>,
      %c0_82 = arith.constant 0 : index
      %c0_83 = arith.constant 0 : index
      %151 = vector.load %arg8[%c0_82, %c0_83] : memref<1x32xf32, #tpu.memory_space<vmem>>, vector<1x32xf32>
      %152 = vector.broadcast %151 : vector<1x32xf32> to vector<16x32xf32>
      %153 = arith.addf %35, %152 : vector<16x32xf32>
      %c0_84 = arith.constant 0 : index
      %c0_85 = arith.constant 0 : index
      %154 = vector.load %arg17[%c0_84, %c0_85] : memref<16x32xbf16, #tpu.memory_space<vmem>>, vector<16x32xbf16>
      %c0_86 = arith.constant 0 : index
      %c0_87 = arith.constant 0 : index
      %155 = vector.load %arg7[%c0_86, %c0_87] : memref<32x32xbf16, #tpu.memory_space<vmem>>, vector<32x32xbf16>
      %cst_88 = arith.constant dense<0.000000e+00> : vector<16x32xf32>
      %156 = tpu.matmul %154, %155, %cst_88 {dimension_numbers = #tpu.dot_dimension_numbers<[1], [0], [0], [1], [0, 0, 1, 1], [], []>} : vector<16x32xbf16>, vector<32x32xbf16>, vector<16x32xf32> -> vector<16x32xf32>
      %157 = arith.addf %153, %156 : vector<16x32xf32>
      %c0_89 = arith.constant 0 : index
      %c0_90 = arith.constant 0 : index
      %158 = vector.load %arg9[%c0_89, %c0_90] : memref<1x32xf32, #tpu.memory_space<vmem>>, vector<1x32xf32>
      %c0_91 = arith.constant 0 : index
      %c0_92 = arith.constant 0 : index
      %159 = vector.load %arg10[%c0_91, %c0_92] : memref<1x32xf32, #tpu.memory_space<vmem>>, vector<1x32xf32>
      %cst_93 = arith.constant dense<0.000000e+00> : vector<16xf32>
      %160 = vector.multi_reduction <add>, %157, %cst_93 [1] : vector<16x32xf32> to vector<16xf32>
      %161 = vector.shape_cast %160 : vector<16xf32> to vector<16x1xf32>
      %cst_94 = arith.constant 3.200000e+01 : f32
      %162 = vector.broadcast %cst_94 : f32 to vector<16x1xf32>
      %163 = arith.divf %161, %162 : vector<16x1xf32>
      %164 = vector.broadcast %163 : vector<16x1xf32> to vector<16x32xf32>
      %165 = arith.subf %157, %164 : vector<16x32xf32>
      %166 = arith.mulf %165, %165 : vector<16x32xf32>
      %cst_95 = arith.constant dense<0.000000e+00> : vector<16xf32>
      %167 = vector.multi_reduction <add>, %166, %cst_95 [1] : vector<16x32xf32> to vector<16xf32>
      %168 = vector.shape_cast %167 : vector<16xf32> to vector<16x1xf32>
      %cst_96 = arith.constant 3.200000e+01 : f32
      %169 = vector.broadcast %cst_96 : f32 to vector<16x1xf32>
      %170 = arith.divf %168, %169 : vector<16x1xf32>
      %171 = vector.broadcast %163 : vector<16x1xf32> to vector<16x32xf32>
      %172 = arith.subf %157, %171 : vector<16x32xf32>
      %cst_97 = arith.constant 9.99999974E-6 : f32
      %173 = vector.broadcast %cst_97 : f32 to vector<16x1xf32>
      %174 = arith.addf %170, %173 : vector<16x1xf32>
      %175 = math.rsqrt %174 : vector<16x1xf32>
      %176 = vector.broadcast %175 : vector<16x1xf32> to vector<16x32xf32>
      %177 = arith.mulf %172, %176 : vector<16x32xf32>
      %178 = vector.broadcast %158 : vector<1x32xf32> to vector<16x32xf32>
      %179 = arith.mulf %177, %178 : vector<16x32xf32>
      %180 = vector.broadcast %159 : vector<1x32xf32> to vector<16x32xf32>
      %181 = arith.addf %179, %180 : vector<16x32xf32>
      %182 = arith.truncf %181 : vector<16x32xf32> to vector<16x32xbf16>
      %c0_98 = arith.constant 0 : index
      %c0_99 = arith.constant 0 : index
      %183 = vector.load %arg18[%c0_98, %c0_99] : memref<16x32xbf16, #tpu.memory_space<vmem>>, vector<16x32xbf16>
      tpu.vector_store %arg18[%c0_98, %c0_99], %182 {strides = array<i32>} : memref<16x32xbf16, #tpu.memory_space<vmem>>, vector<16x32xbf16>,
      %c0_100 = arith.constant 0 : index
      %c0_101 = arith.constant 0 : index
      %184 = vector.load %arg14[%c0_100, %c0_101] : memref<1x32xf32, #tpu.memory_space<vmem>>, vector<1x32xf32>
      %185 = vector.broadcast %184 : vector<1x32xf32> to vector<16x32xf32>
      %186 = arith.addf %157, %185 : vector<16x32xf32>
      %c0_102 = arith.constant 0 : index
      %c0_103 = arith.constant 0 : index
      %187 = vector.load %arg19[%c0_102, %c0_103] : memref<16x32xf32, #tpu.memory_space<vmem>>, vector<16x32xf32>
      tpu.vector_store %arg19[%c0_102, %c0_103], %186 {strides = array<i32>} : memref<16x32xf32, #tpu.memory_space<vmem>>, vector<16x32xf32>,
    } else {
    }
    %c0 = arith.constant 0 : index
    %c0_1 = arith.constant 0 : index
    %3 = vector.load %arg18[%c0, %c0_1] : memref<16x32xbf16, #tpu.memory_space<vmem>>, vector<16x32xbf16>
    %c0_2 = arith.constant 0 : index
    %c0_3 = arith.constant 0 : index
    %c0_4 = arith.constant 0 : index
    %4 = vector.load %arg11[%c0_2, %c0_3, %c0_4] : memref<1x32x128xbf16, #tpu.memory_space<vmem>>, vector<1x32x128xbf16>
    %5 = vector.shape_cast %4 : vector<1x32x128xbf16> to vector<32x128xbf16>
    %cst = arith.constant dense<0.000000e+00> : vector<16x128xf32>
    %6 = tpu.matmul %3, %5, %cst {dimension_numbers = #tpu.dot_dimension_numbers<[1], [0], [0], [1], [0, 0, 1, 1], [], []>} : vector<16x32xbf16>, vector<32x128xbf16>, vector<16x128xf32> -> vector<16x128xf32>
    %c0_5 = arith.constant 0 : index
    %c0_6 = arith.constant 0 : index
    %c0_7 = arith.constant 0 : index
    %7 = vector.load %arg12[%c0_5, %c0_6, %c0_7] : memref<1x1x128xf32, #tpu.memory_space<vmem>>, vector<1x1x128xf32>
    %8 = vector.shape_cast %7 : vector<1x1x128xf32> to vector<1x128xf32>
    %9 = vector.broadcast %8 : vector<1x128xf32> to vector<16x128xf32>
    %10 = arith.addf %6, %9 : vector<16x128xf32>
    %cst_8 = arith.constant 5.000000e-01 : f32
    %11 = vector.broadcast %cst_8 : f32 to vector<16x128xf32>
    %12 = arith.mulf %11, %10 : vector<16x128xf32>
    %cst_9 = arith.constant 4.471500e-02 : f32
    %13 = vector.broadcast %cst_9 : f32 to vector<16x128xf32>
    %14 = arith.mulf %13, %10 : vector<16x128xf32>
    %15 = arith.mulf %14, %10 : vector<16x128xf32>
    %16 = arith.mulf %15, %10 : vector<16x128xf32>
    %17 = arith.addf %10, %16 : vector<16x128xf32>
    %cst_10 = arith.constant 0.797884583 : f32
    %18 = vector.broadcast %cst_10 : f32 to vector<16x128xf32>
    %19 = arith.mulf %18, %17 : vector<16x128xf32>
    %20 = math.tanh %19 : vector<16x128xf32>
    %cst_11 = arith.constant 1.000000e+00 : f32
    %21 = vector.broadcast %cst_11 : f32 to vector<16x128xf32>
    %22 = arith.addf %21, %20 : vector<16x128xf32>
    %23 = arith.mulf %12, %22 : vector<16x128xf32>
    %c0_12 = arith.constant 0 : index
    %c0_13 = arith.constant 0 : index
    %24 = vector.load %arg19[%c0_12, %c0_13] : memref<16x32xf32, #tpu.memory_space<vmem>>, vector<16x32xf32>
    %25 = arith.truncf %23 : vector<16x128xf32> to vector<16x128xbf16>
    %c0_14 = arith.constant 0 : index
    %c0_15 = arith.constant 0 : index
    %c0_16 = arith.constant 0 : index
    %26 = vector.load %arg13[%c0_14, %c0_15, %c0_16] : memref<1x128x32xbf16, #tpu.memory_space<vmem>>, vector<1x128x32xbf16>
    %27 = vector.shape_cast %26 : vector<1x128x32xbf16> to vector<128x32xbf16>
    %cst_17 = arith.constant dense<0.000000e+00> : vector<16x32xf32>
    %28 = tpu.matmul %25, %27, %cst_17 {dimension_numbers = #tpu.dot_dimension_numbers<[1], [0], [0], [1], [0, 0, 1, 1], [], []>} : vector<16x128xbf16>, vector<128x32xbf16>, vector<16x32xf32> -> vector<16x32xf32>
    %29 = arith.addf %24, %28 : vector<16x32xf32>
    %c0_18 = arith.constant 0 : index
    %c0_19 = arith.constant 0 : index
    %30 = vector.load %arg19[%c0_18, %c0_19] : memref<16x32xf32, #tpu.memory_space<vmem>>, vector<16x32xf32>
    tpu.vector_store %arg19[%c0_18, %c0_19], %29 {strides = array<i32>} : memref<16x32xf32, #tpu.memory_space<vmem>>, vector<16x32xf32>,
    %c0_i32_20 = arith.constant 0 : i32
    %31 = arith.cmpi eq, %arg1, %c0_i32_20 : i32
    %32 = arith.extui %31 : i1 to i32
    %c0_i32_21 = arith.constant 0 : i32
    %33 = arith.cmpi ne, %32, %c0_i32_21 : i32
    scf.if %33 {
      %c0_22 = arith.constant 0 : index
      %c0_23 = arith.constant 0 : index
      %34 = vector.load %arg19[%c0_22, %c0_23] : memref<16x32xf32, #tpu.memory_space<vmem>>, vector<16x32xf32>
      %c0_24 = arith.constant 0 : index
      %c0_25 = arith.constant 0 : index
      %c0_26 = arith.constant 0 : index
      %35 = vector.load %arg15[%c0_24, %c0_25, %c0_26] : memref<1x16x32xf32, #tpu.memory_space<vmem>>, vector<1x16x32xf32>
      %36 = vector.shape_cast %35 : vector<1x16x32xf32> to vector<16x32xf32>
      %37 = vector.shape_cast %34 : vector<16x32xf32> to vector<1x16x32xf32>
      tpu.vector_store %arg15[%c0_24, %c0_25, %c0_26], %37 {strides = array<i32>} : memref<1x16x32xf32, #tpu.memory_space<vmem>>, vector<1x16x32xf32>,
    } else {
    }
    return
  }
  func.func @transform_0(%arg0: i32, %arg1: i32) -> (i32, i32, i32) {
    %c0_i32 = arith.constant 0 : i32
    %c0_i32_0 = arith.constant 0 : i32
    %c0_i32_1 = arith.constant 0 : i32
    return %arg0, %c0_i32, %c0_i32_0 : i32, i32, i32
  }
  func.func @transform_1(%arg0: i32, %arg1: i32) -> (i32, i32) {
    %c0_i32 = arith.constant 0 : i32
    %c0_i32_0 = arith.constant 0 : i32
    %c0_i32_1 = arith.constant 0 : i32
    return %c0_i32, %c0_i32_0 : i32, i32
  }
  func.func @transform_2(%arg0: i32, %arg1: i32) -> (i32, i32) {
    %c0_i32 = arith.constant 0 : i32
    %c0_i32_0 = arith.constant 0 : i32
    %c0_i32_1 = arith.constant 0 : i32
    return %c0_i32, %c0_i32_0 : i32, i32
  }
  func.func @transform_3(%arg0: i32, %arg1: i32) -> (i32, i32) {
    %c0_i32 = arith.constant 0 : i32
    %c0_i32_0 = arith.constant 0 : i32
    %c0_i32_1 = arith.constant 0 : i32
    return %c0_i32, %c0_i32_0 : i32, i32
  }
  func.func @transform_4(%arg0: i32, %arg1: i32) -> (i32, i32) {
    %c0_i32 = arith.constant 0 : i32
    %c0_i32_0 = arith.constant 0 : i32
    %c0_i32_1 = arith.constant 0 : i32
    return %c0_i32, %c0_i32_0 : i32, i32
  }
  func.func @transform_5(%arg0: i32, %arg1: i32) -> (i32, i32) {
    %c0_i32 = arith.constant 0 : i32
    %c0_i32_0 = arith.constant 0 : i32
    %c0_i32_1 = arith.constant 0 : i32
    return %c0_i32, %c0_i32_0 : i32, i32
  }
  func.func @transform_6(%arg0: i32, %arg1: i32) -> (i32, i32) {
    %c0_i32 = arith.constant 0 : i32
    %c0_i32_0 = arith.constant 0 : i32
    %c0_i32_1 = arith.constant 0 : i32
    return %c0_i32, %c0_i32_0 : i32, i32
  }
  func.func @transform_7(%arg0: i32, %arg1: i32) -> (i32, i32) {
    %c0_i32 = arith.constant 0 : i32
    %c0_i32_0 = arith.constant 0 : i32
    %c0_i32_1 = arith.constant 0 : i32
    return %c0_i32, %c0_i32_0 : i32, i32
  }
  func.func @transform_8(%arg0: i32, %arg1: i32) -> (i32, i32) {
    %c0_i32 = arith.constant 0 : i32
    %c0_i32_0 = arith.constant 0 : i32
    %c0_i32_1 = arith.constant 0 : i32
    return %c0_i32, %c0_i32_0 : i32, i32
  }
  func.func @transform_9(%arg0: i32, %arg1: i32) -> (i32, i32, i32) {
    %c0_i32 = arith.constant 0 : i32
    %c0_i32_0 = arith.constant 0 : i32
    %c0_i32_1 = arith.constant 0 : i32
    return %arg1, %c0_i32, %c0_i32_0 : i32, i32, i32
  }
  func.func @transform_10(%arg0: i32, %arg1: i32) -> (i32, i32, i32) {
    %c0_i32 = arith.constant 0 : i32
    %c0_i32_0 = arith.constant 0 : i32
    %c0_i32_1 = arith.constant 0 : i32
    return %arg1, %c0_i32, %c0_i32_0 : i32, i32, i32
  }
  func.func @transform_11(%arg0: i32, %arg1: i32) -> (i32, i32, i32) {
    %c0_i32 = arith.constant 0 : i32
    %c0_i32_0 = arith.constant 0 : i32
    %c0_i32_1 = arith.constant 0 : i32
    return %arg1, %c0_i32, %c0_i32_0 : i32, i32, i32
  }
  func.func @transform_12(%arg0: i32, %arg1: i32) -> (i32, i32) {
    %c0_i32 = arith.constant 0 : i32
    %c0_i32_0 = arith.constant 0 : i32
    %c0_i32_1 = arith.constant 0 : i32
    return %c0_i32, %c0_i32_0 : i32, i32
  }
  func.func @transform_13(%arg0: i32, %arg1: i32) -> (i32, i32, i32) {
    %c0_i32 = arith.constant 0 : i32
    %c0_i32_0 = arith.constant 0 : i32
    %c0_i32_1 = arith.constant 0 : i32
    return %arg0, %c0_i32, %c0_i32_0 : i32, i32, i32
  }
}

</mosaic_0001>

<bundles_post_ra>
// kernel: tpu_custom_call.1
= control target key start
LH: loop header
LB: loop body
LE: loop exit
PB: predicated region body
PF: predicated region fallthrough
CT: control target
= control target key end

     0   :  { %s2154_s0 = inlined_call_operand.vmem [shape: f32[2,16,32], index: 0, kind: input, shape index: {}]   ;;  %s2155_s1 = inlined_call_operand.hbm [shape: f32[1,32], index: 1, kind: input, shape index: {}]   ;;  %s2156_s2 = inlined_call_operand.vmem [shape: f32[1,32], index: 2, kind: input, shape index: {}]   ;;  %s2157_s3 = inlined_call_operand.vmem [shape: bf16[32,96], index: 3, kind: input, shape index: {}]   ;;  %s2158_s4 = inlined_call_operand.vmem [shape: f32[1,96], index: 4, kind: input, shape index: {}]   ;;  %s2159_s5 = inlined_call_operand.vmem [shape: bf16[32,32], index: 5, kind: input, shape index: {}]   ;;  %s2160_s6 = inlined_call_operand.vmem [shape: f32[1,32], index: 6, kind: input, shape index: {}]   ;;  %s2161_s7 = inlined_call_operand.vmem [shape: f32[1,32], index: 7, kind: input, shape index: {}]   ;;  %s2162_s8 = inlined_call_operand.vmem [shape: f32[1,32], index: 8, kind: input, shape index: {}]   ;;  %s2163_s9 = inlined_call_operand.vmem [shape: bf16[1,32,128], index: 9, kind: input, shape index: {}]   ;;  %s2164_s10 = inlined_call_operand.vmem [shape: f32[1,1,128], index: 10, kind: input, shape index: {}]   ;;  %s2165_s11 = inlined_call_operand.vmem [shape: bf16[1,128,32], index: 11, kind: input, shape index: {}]   ;;  %s2166_s12 = inlined_call_operand.vmem [shape: f32[1,32], index: 12, kind: input, shape index: {}]   ;;  %s2167_s13 = inlined_call_operand.hbm [shape: f32[2,16,32], index: 13, kind: output, shape index: {}]  }
   0x1   :  { %2171 = sst [smem:[#allocation14_spill]] %s2154_s0 }
   0x2   :  { %2172 = sst [smem:[#allocation15_spill]] %s2155_s1 }
   0x3   :  { %2173 = sst [smem:[#allocation16_spill]] %s2156_s2 }
   0x4   :  { %18 = vsyncpa [#allocation7], 0 }
   0x5   :  { %19 = vsyncpa [#allocation8], 0 }
   0x6   :  { %21 = vsyncpa [#allocation8 + $0x1], 0  ;;  %s1869_s25 = smov 0   ;;  %s1871_s26 = smov 0  }
   0x7   :  { %s1873_s27 = smov 0   ;;  %s1875_s28 = smov 0  }
   0x8   :  { %s1877_s29 = smov 0   ;;  %s1879_s30 = smov 0  }
   0x9 LB: > { %2174 = sst [smem:[#allocation12_spill]] %s1760_s25  ;;  %s1401_s14 = sadd.s32 4294967295, %s1780_s30   ;;  %s1780_s30 = sphi %s1879_s30, %s27_s30   ;;  %s1776_s29 = sphi %s1877_s29, %s2188_s29   ;;  %s1772_s28 = sphi %s1875_s28, %s2187_s28   ;;  %s1768_s27 = sphi %s1873_s27, %s2186_s27   ;;  %s1764_s26 = sphi %s1871_s26, %s2185_s26   ;;  %s1760_s25 = sphi %s1869_s25, %s2184_s25  }
   0xa   : > { %s1402_s15 = sadd.s32 4294967294, %s1780_s30   ;;  %s39_s16 = sadd.s32 1, %s1776_s29 }
   0xb   : > { %s339_s17 = sadd.s32 1, %s1768_s27  ;;  %p41_p0 = scmp.ge.s32.totalorder %s39_s16, 2 }
   0xc   : > { %p349_p1 = scmp.ne.s32.totalorder %s1768_s27, %s1764_s26  ;;  %p350_p2 = scmp.eq.s32.totalorder %s1401_s14, 1 }
   0xd   : > { %p355_p3 = scmp.ne.s32.totalorder %s1764_s26, %s1760_s25  ;;  %s2190_s16 = smov (%p41_p0, %s39_s16), 0 }
   0xe   : > { %2175 = sst [smem:[#allocation13_spill]] %s2190_s16  ;;  %p1909_p4 = por %p350_p2, %p349_p1 }
   0xf   : > { %p356_p5 = scmp.eq.s32.totalorder %s1402_s15, 1  ;;  %s336_s19 = ssub.s32 %s1776_s29, %s2190_s16 }
  0x10   : > { %p1403_p6 = scmp.ge.s32.totalorder %s1780_s30, 1  ;;  %p337_p7 = scmp.eq.s32.totalorder %s336_s19, 0 }
  0x11   : > { %p1916_p8 = por %p356_p5, %p355_p3  ;;  %p363_p9 = scmp.lt.s32.totalorder %s1780_s30, 3 }
  0x12   : > { %s1922_s21 = scalar_select %p337_p7, %s1768_s27, %s339_s17  }
  0x13   : > { %p364_p10 = pnand %p1403_p6, %p363_p9  ;;  %p1546_p11 = scmp.eq.s32.totalorder %s1401_s14, 0 }
  0x14   : > { %s2178_s1 = sld [smem:[#allocation15_spill]]  ;;  %s1782_s25 = smov [#allocation6]  }
  0x15   : > { %p1538_p12 = pneg %p364_p10  ;;  %s377_s15 = sshll.u32 %s1782_s25, 4  ;;  %s378_s15 = int_to_ptr.vmem [resolvable:$true] %s377_s15 }
  0x17   : > { %p1539_p13 = pnand %p1546_p11, %p1538_p12  ;;  %444 = sbr.rel (%p364_p10) target bundleno = 2140 (0x85c), region = 72 }
  0x1a   : > { %s375_s24 = sshll.u32 %s2178_s1, 4  ;;  %s376_s24 = int_to_ptr.hbm [resolvable:$true] %s375_s24 }
  0x1b   : > { %1541 = dma.hbm_to_vmem [thread:$0]  (!%p1539_p13), %s376_s24, 16, %s378_s15, [#allocation7]  }
  0x1c   : > { %1751 = dma.done.wait (%p1546_p11), [#allocation7], 16  }
  0x1d   : > { %1753 = vsyncadd (%p1546_p11), [#allocation7], 4294967280  ;;  %p502_p0 = scmp.lt.s32.totalorder %s1772_s28, 1  ;;  %s2179_s0 = sld [smem:[#allocation14_spill]]  ;;  %vm529_vm0 = vcmask 261120   ;;  %v1783_v4 = vmov 32.0  }
  0x1e   : > { %1622 = vrcp.f32 %v1783_v4  ;;  %v1512_v21 = vld [vmem:[%s2157_s3 + $0x8] sm:$0xff]  ;;  %v1511_v23 = vld [vmem:[%s2157_s3] sm:$0xff]  ;;  %s2180_s2 = sld [smem:[#allocation16_spill]]  ;;  %vm631_vm8 = vcmask 781312   ;;  %s1785_s25 = smov 64   ;;  %vm650_vm9 = vcmask 64512  }
  0x1f   : > { %s503_s17 = scalar_select %p502_p0, %s1772_s28, 1  ;;  %621 = vmatpush.bf16.msra.mxu0 %v1512_v21  ;;  %v1614_v42 = vld [vmem:[#allocation6] ss:$0 sm:$0xff]  ;;  %v1616_v52 = vld [vmem:[%s2158_s4] ss:$0 sm:$0xff]  ;;  %vm673_vm11 = vcmask 130048  }
  0x20   : > { %s1786_s16 = smov 96   ;;  %s1787_s23 = smov 120   ;;  %vm719_vm13 = vcmask 60416   ;;  %vm808_vm14 = vcmask 126016   ;;  %vm897_vm15 = vcmask 191616  }
  0x21   : > { %s1510_s19 = sshll.u32 %s503_s17, 4  ;;  %s1788_s24 = smov 104  }
  0x22   : > { %s1789_s15 = smov 80   ;;  %s1790_s17 = smov 72  }
  0x23   : > { %s506_s22 = scalar_lea.vmem %s2179_s0, %s1510_s19  ;;  %622 = vmatpush.bf16.msra.mxu0 %v1511_v23  ;;  %s1791_s19 = smov 56  }
  0x24   : > { %v1932_v0 = vld [vmem:[%s506_s22] sm:$0xff]  ;;  %v1936_v2 = vld [vmem:[%s506_s22 + $0x8] sm:$0xff]  ;;  %v1623_v5 = vpop.eup %1622  ;;  %s1784_s22 = smov 88   ;;  %s1792_s14 = smov 112  }
  0x25   : > { %v530_v1 = vsel %vm529_vm0, %v1932_v0, 0.0  ;;  %v533_v3 = vsel %vm529_vm0, %v1936_v2, 0.0  ;;  %v537_v6 = vmul.f32 32.0, %v1623_v5  ;;  %vm541_vm1 = vweird.f32 %v1623_v5  ;;  %v1615_v47 = vld [vmem:[%s2180_s2] ss:$0 sm:$0xff]  ;;  %s499_s0 = sand.u32 1, %s1764_s26  }
  0x26   : > { %531 = vadd.xlane.f32.xlu0 %v530_v1 }
  0x27   : > { %v538_v7 = vsub.f32 1.0, %v537_v6 }
  0x29   : > { %v539_v8 = vmul.f32 %v1623_v5, %v538_v7 }
  0x2b   : > { %v540_v9 = vadd.f32 %v1623_v5, %v539_v8 }
  0x2d   : > { %v1940_v10 = vsel %vm541_vm1, %v1623_v5, %v540_v9  ;;  %v634_v5 = vlaneseq  ;;  %vm986_vm1 = vcmask 257216  }
  0x2e   : > { %534 = vadd.xlane.f32.xlu0 %v533_v3 }
  0x2f   : > { %v1969_v6 = vshrl.u32 %v634_v5, 7  ;;  %v1971_v7 = vand.u32 127, %v634_v5 }
  0x31   : > { %vm639_vm10 = vcmp.le.s32.totalorder %v1971_v7, %v1969_v6 }
  0x99   : > { %v532_v11 = vpop.xlane.xlu0 %531 }
  0x9a   : > { %v543_v12 = vmul.f32 %v1940_v10, %v532_v11 }
  0x9c   : > { %v545_v13 = vsub.f32 %v1932_v0, %v543_v12  ;;  %v636_v12 = vadd.s32 8, %v1969_v6 }
  0x9e   : > { %v547_v14 = vmul.f32 %v545_v13, %v545_v13  ;;  %vm640_vm12 = vcmp.le.s32.totalorder %v1971_v7, %v636_v12 }
  0xa0   : > { %v549_v15 = vsel %vm529_vm0, %v547_v14, 0.0 }
  0xa1   : > { %550 = vadd.xlane.f32.xlu1 %v549_v15  ;;  %v535_v16 = vpop.xlane.xlu0 %534 }
  0xa2   : > { %v544_v17 = vmul.f32 %v1940_v10, %v535_v16 }
  0xa4   : > { %v546_v18 = vsub.f32 %v1936_v2, %v544_v17 }
  0xa6   : > { %v548_v19 = vmul.f32 %v546_v18, %v546_v18 }
  0xa8   : > { %v552_v20 = vsel %vm529_vm0, %v548_v19, 0.0 }
  0xa9   : > { %553 = vadd.xlane.f32.xlu1 %v552_v20 }
 0x114   : > { %v551_v22 = vpop.xlane.xlu1 %550 }
 0x115   : > { %v555_v24 = vmul.f32 %v551_v22, %v1940_v10 }
 0x117   : > { %v557_v25 = vadd.f32 1e-05, %v555_v24 }
 0x119   : > { %1624 = vrsqrt.f32 %v557_v25  ;;  %vm565_vm3 = vweird.f32 %v557_v25 }
 0x11c   : > { %v554_v26 = vpop.xlane.xlu1 %553 }
 0x11d   : > { %v556_v27 = vmul.f32 %v554_v26, %v1940_v10 }
 0x11f   : > { %v1625_v28 = vpop.eup %1624  ;;  %v558_v29 = vadd.f32 1e-05, %v556_v27 }
 0x120   : > { %v560_v30 = vmul.f32 %v1625_v28, %v557_v25  ;;  %vm566_vm2 = vweird.f32 %v1625_v28 }
 0x121   : > { %1626 = vrsqrt.f32 %v558_v29  ;;  %vm567_vm4 = vmor %vm565_vm3, %vm566_vm2  ;;  %vm575_vm6 = vweird.f32 %v558_v29 }
 0x122   : > { %v561_v31 = vmul.f32 %v1625_v28, %v560_v30 }
 0x124   : > { %v562_v32 = vmul.f32 0.5, %v561_v31 }
 0x126   : > { %v563_v33 = vsub.f32 1.5, %v562_v32 }
 0x127   : > { %v1627_v34 = vpop.eup %1626 }
 0x128   : > { %v564_v35 = vmul.f32 %v1625_v28, %v563_v33  ;;  %v570_v36 = vmul.f32 %v1627_v34, %v558_v29  ;;  %vm576_vm5 = vweird.f32 %v1627_v34 }
 0x129   : > { %vm577_vm7 = vmor %vm575_vm6, %vm576_vm5  ;;  %vm1095_vm6 = vcmask 257024  }
 0x12a   : > { %v571_v37 = vmul.f32 %v1627_v34, %v570_v36  ;;  %v568_v38 = vsel %vm567_vm4, %v1625_v28, %v564_v35 }
 0x12b   : > { %v579_v41 = vmul.f32 %v568_v38, %v545_v13 }
 0x12c   : > { %v572_v39 = vmul.f32 0.5, %v571_v37 }
 0x12d   : > { %v584_v46 = vmul.f32 %v1614_v42, %v579_v41 }
 0x12e   : > { %v573_v40 = vsub.f32 1.5, %v572_v39 }
 0x12f   : > { %v589_v49 = vadd.f32 %v1615_v47, %v584_v46 }
 0x130   : > { %v574_v43 = vmul.f32 %v1627_v34, %v573_v40 }
 0x132   : > { %v578_v44 = vsel %vm577_vm7, %v1627_v34, %v574_v43 }
 0x133   : > { %v580_v45 = vmul.f32 %v578_v44, %v546_v18 }
 0x135   : > { %v585_v48 = vmul.f32 %v1614_v42, %v580_v45 }
 0x137   : > { %v590_v50 = vadd.f32 %v1615_v47, %v585_v48 }
 0x139   : > { %v591_v51 = vpack.c.bf16 %v590_v50, %v589_v49 }
 0x13b   : > { %1422 = vmatmul.msk.bf16.vlgmr.msra.gmra.mxu0 %vm529_vm0, %v591_v51 }
 0x1b8   : > { %v624_v53 = vpop.f32.mrf.mxu0 }
 0x1b9   : > { %v625_v54 = vadd.f32 %v1616_v52, %v624_v53 }
 0x1bb   : > { %v629_v55 = vpack.c.bf16 %v625_v54, %v625_v54 }
 0x1bd   : > { %632 = vst.msk [vmem:[#allocation2] sm:$0xf] %vm631_vm8, %v629_v55 }
 0x1c0   : > { %v626_v56 = vpop.f32.mrf.mxu0 }
 0x1c1   : > { %v627_v57 = vadd.f32 %v1616_v52, %v626_v56 }
 0x1c3   : > { %v630_v58 = vpack.c.bf16 %v627_v57, %v627_v57 }
 0x1c5   : > { %633 = vst.msk [vmem:[#allocation2 + $0x4] sm:$0xf] %vm631_vm8, %v630_v58 }
 0x1cc   : > { %v1514_v59 = vld [vmem:[#allocation2] sm:$0xff] }
 0x1cd   : > { %v1513_v60 = vld [vmem:[#allocation2] sm:$0xff]  ;;  %731 = vrot.lane.b32.xlu0 %v1514_v59, %s1784_s22  ;;  %s1793_s22 = smov 40  }
 0x1ce   : > { %693 = vrot.lane.b32.xlu1 %v1513_v60, %s1785_s25  ;;  %648 = vrot.lane.b32.xlu2 %v1513_v60, %s1786_s16  ;;  %v1963_v61 = vld [vmem:[#allocation2] sm:$0xff]  ;;  %s1794_s25 = smov 48   ;;  %s2170_s16 = smov 8  }
 0x1cf   : > { %v1984_v16 = vld [vmem:[#allocation2] sm:$0xff] }
 0x1d6   : > { %729 = vrot.lane.b32.xlu1 %v1514_v59, %s1787_s23  ;;  %s1796_s23 = smov 16  }
 0x1de   : > { %907 = vrot.lane.b32.xlu1 %v1963_v61, %s1788_s24  ;;  %s1797_s24 = smov 24  }
 0x228   : > { %v649_v62 = vpop.permute.xlu2 %648 }
 0x229   : > { %v655_v63 = vsel %vm650_vm9, %v649_v62, 0 }
 0x22a   : > { %664 = vmatpush.bf16.xpose.msra.mxu1 %v655_v63 }
 0x231   : > { %1427 = vmatmul.msk.bf16.vlgmr.msra.gmra.mxu1 %vm650_vm9, %v1513_v60 }
 0x23f   : > { %v732_v1 = vpop.permute.xlu0 %731 }
 0x240   : > { %v694_v3 = vpop.permute.xlu1 %693  ;;  %v737_v4 = vsel %vm650_vm9, %v732_v1, 0 }
 0x241   : > { %706 = vmatpush.bf16.msra.mxu2 %v694_v3 }
 0x245   : > { %746 = vmatpush.bf16.xpose.msrb.mxu2 %v737_v4 }
 0x248   : > { %v730_v29 = vpop.permute.xlu1 %729 }
 0x250   : > { %v908_v32 = vpop.permute.xlu1 %907 }
 0x2ae   : > { %v666_v8 = vpop.f32.mrf.mxu1 }
 0x2af   : > { %v671_v9 = vsel %vm639_vm10, %v666_v8, -1e+30 }
 0x2b0   : > { %v674_v11 = vsel %vm673_vm11, %v671_v9, -inf }
 0x2b1   : > { %675 = vmax.xlane.f32.xlu2 %v674_v11 }
 0x2b6   : > { %v668_v13 = vpop.f32.mrf.mxu1 }
 0x2b7   : > { %v672_v14 = vsel %vm640_vm12, %v668_v13, -1e+30 }
 0x2b8   : > { %v677_v15 = vsel %vm673_vm11, %v672_v14, -inf }
 0x2b9   : > { %678 = vmax.xlane.f32.xlu0 %v677_v15 }
 0x2c9   : > { %820 = vrot.lane.b32.xlu2 %v1984_v16, %s1789_s15  ;;  %s1531_s15 = sshll.u32 %s1772_s28, 4  ;;  %s1262_s28 = scalar_lea.sflag [#allocation8], %s499_s0 }
 0x2cd   : > { %909 = vrot.lane.b32.xlu0 %v1963_v61, %s1790_s17 }
 0x2d1   : > { %774 = vrot.lane.b32.xlu2 %v1514_v59, %s1791_s19 }
 0x2d5   : > { %818 = vrot.lane.b32.xlu0 %v1984_v16, %s1792_s14  ;;  %s1273_s14 = scalar_lea.hbm %s2167_s13, %s1531_s15 }
 0x324   : > { %v676_v17 = vpop.xlane.xlu2 %675 }
 0x325   : > { %v680_v18 = vsub.f32 %v671_v9, %v676_v17 }
 0x327   : > { %v682_v19 = vmul.f32 1.442695, %v680_v18 }
 0x329   : > { %1628 = vpow2.f32 %v682_v19 }
 0x32c   : > { %v821_v20 = vpop.permute.xlu2 %820  ;;  %v679_v21 = vpop.xlane.xlu0 %678 }
 0x32d   : > { %v681_v22 = vsub.f32 %v672_v14, %v679_v21  ;;  %v826_v23 = vsel %vm650_vm9, %v821_v20, 0 }
 0x32e   : > { %835 = vmatpush.bf16.xpose.msrb.mxu0 %v826_v23 }
 0x32f   : > { %v684_v24 = vmul.f32 1.442695, %v681_v22  ;;  %v1990_v25 = vpop.eup %1628 }
 0x331   : > { %1630 = vpow2.f32 %v684_v24  ;;  %v686_v24 = vsel %vm673_vm11, %v1990_v25, 0.0 }
 0x334   : > { %v775_v28 = vpop.permute.xlu2 %774 }
 0x337   : > { %v1992_v26 = vpop.eup %1630 }
 0x338   : > { %v692_v27 = vpack.c.bf16 %v1992_v26, %v1990_v25 }
 0x33a   : > { %1428 = vmatmul.msk.bf16.vlgmr.msra.gmra.mxu2 %vm673_vm11, %v692_v27 }
 0x33b   : > { %787 = vmatpush.bf16.msra.mxu2 %v775_v28 }
 0x33f   : > { %v910_v30 = vpop.permute.xlu0 %909 }
 0x340   : > { %v915_v31 = vsel %vm650_vm9, %v910_v30, 0 }
 0x341   : > { %924 = vmatpush.bf16.xpose.msra.mxu3 %v915_v31  ;;  %v689_v31 = vsel %vm673_vm11, %v1992_v26, 0.0 }
 0x347   : > { %v819_v33 = vpop.permute.xlu0 %818 }
 0x348   : > { %1439 = vmatmul.msk.bf16.vlgmr.msrb.gmra.mxu0 %vm650_vm9, %v819_v33  ;;  %1445 = vmatmul.msk.bf16.vlgmr.msra.gmra.mxu3 %vm650_vm9, %v908_v32 }
 0x34a   : > { %1433 = vmatmul.msk.bf16.vlgmr.msrb.gmra.mxu2 %vm650_vm9, %v730_v29 }
 0x3bd   : > { %v2001_v34 = vpop.f32.mrf.mxu2 }
 0x3c5   : > { %v2003_v35 = vpop.f32.mrf.mxu2  ;;  %v837_v36 = vpop.f32.mrf.mxu0 }
 0x3c6   : > { %v842_v37 = vsel %vm639_vm10, %v837_v36, -1e+30 }
 0x3c7   : > { %v844_v38 = vsel %vm673_vm11, %v842_v37, -inf }
 0x3c8   : > { %845 = vmax.xlane.f32.xlu0 %v844_v38 }
 0x3cb   : > { %v926_v39 = vpop.f32.mrf.mxu3 }
 0x3cc   : > { %v931_v40 = vsel %vm639_vm10, %v926_v39, -1e+30 }
 0x3cd   : > { %v748_v41 = vpop.f32.mrf.mxu2  ;;  %v839_v42 = vpop.f32.mrf.mxu0  ;;  %v933_v43 = vsel %vm673_vm11, %v931_v40, -inf }
 0x3ce   : > { %v843_v44 = vsel %vm640_vm12, %v839_v42, -1e+30  ;;  %934 = vmax.xlane.f32.xlu2 %v933_v43  ;;  %v753_v52 = vsel %vm639_vm10, %v748_v41, -1e+30 }
 0x3cf   : > { %v847_v45 = vsel %vm673_vm11, %v843_v44, -inf  ;;  %v755_v53 = vsel %vm673_vm11, %v753_v52, -inf }
 0x3d0   : > { %848 = vmax.xlane.f32.xlu1 %v847_v45 }
 0x3d3   : > { %v928_v46 = vpop.f32.mrf.mxu3 }
 0x3d4   : > { %v932_v47 = vsel %vm640_vm12, %v928_v46, -1e+30 }
 0x3d5   : > { %v750_v48 = vpop.f32.mrf.mxu2  ;;  %v936_v51 = vsel %vm673_vm11, %v932_v47, -inf }
 0x3d6   : > { %v754_v49 = vsel %vm640_vm12, %v750_v48, -1e+30 }
 0x3d7   : > { %v758_v50 = vsel %vm673_vm11, %v754_v49, -inf }
 0x3d8   : > { %759 = vmax.xlane.f32.xlu0 %v758_v50  ;;  %937 = vmax.xlane.f32.xlu1 %v936_v51 }
 0x3e0   : > { %756 = vmax.xlane.f32.xlu1 %v755_v53 }
 0x3ec   : > { %952 = vrot.lane.b32.xlu0 %v1963_v61, %s1793_s22 }
 0x3f9   : > { %863 = vrot.lane.b32.xlu1 %v1984_v16, %s1794_s25 }
 0x43b   : > { %v846_v54 = vpop.xlane.xlu0 %845 }
 0x43c   : > { %v850_v55 = vsub.f32 %v842_v37, %v846_v54 }
 0x43e   : > { %v852_v56 = vmul.f32 1.442695, %v850_v55 }
 0x440   : > { %1632 = vpow2.f32 %v852_v56 }
 0x441   : > { %v935_v57 = vpop.xlane.xlu2 %934 }
 0x442   : > { %v939_v58 = vsub.f32 %v931_v40, %v935_v57 }
 0x443   : > { %v849_v59 = vpop.xlane.xlu1 %848 }
 0x444   : > { %v941_v60 = vmul.f32 1.442695, %v939_v58  ;;  %v851_v62 = vsub.f32 %v843_v44, %v849_v59 }
 0x446   : > { %v1633_v63 = vpop.eup %1632  ;;  %1634 = vpow2.f32 %v941_v60  ;;  %v854_v1 = vmul.f32 1.442695, %v851_v62 }
 0x447   : > { %v856_v3 = vsel %vm673_vm11, %v1633_v63, 0.0 }
 0x448   : > { %1636 = vpow2.f32 %v854_v1  ;;  %857 = vadd.xlane.f32.xlu2 %v856_v3 }
 0x44b   : > { %v760_v61 = vpop.xlane.xlu0 %759  ;;  %v938_v4 = vpop.xlane.xlu1 %937 }
 0x44c   : > { %v1635_v5 = vpop.eup %1634  ;;  %v762_v6 = vsub.f32 %v754_v49, %v760_v61  ;;  %v940_v7 = vsub.f32 %v932_v47, %v938_v4 }
 0x44d   : > { %v945_v8 = vsel %vm673_vm11, %v1635_v5, 0.0 }
 0x44e   : > { %v1637_v9 = vpop.eup %1636  ;;  %v765_v11 = vmul.f32 1.442695, %v762_v6  ;;  %v943_v12 = vmul.f32 1.442695, %v940_v7  ;;  %946 = vadd.xlane.f32.xlu1 %v945_v8  ;;  %v1519_v7 = vld [vmem:[%s2159_s5 + $0x8] sm:$0xff]  ;;  %v1518_v8 = vld [vmem:[%s2159_s5] sm:$0xff] }
 0x44f   : > { %v859_v13 = vsel %vm673_vm11, %v1637_v9, 0.0  ;;  %v862_v29 = vpack.c.bf16 %v1637_v9, %v1633_v63  ;;  %1027 = vmatpush.bf16.msra.mxu0 %v1519_v7  ;;  %v1529_v7 = vld [vmem:[%s2165_s11 + $0x30] sm:$0xff] }
 0x450   : > { %1638 = vpow2.f32 %v765_v11  ;;  %860 = vadd.xlane.f32.xlu2 %v859_v13 }
 0x451   : > { %1640 = vpow2.f32 %v943_v12 }
 0x453   : > { %v757_v14 = vpop.xlane.xlu1 %756  ;;  %1028 = vmatpush.bf16.msra.mxu0 %v1518_v8  ;;  %v1528_v8 = vld [vmem:[%s2165_s11 + $0x28] sm:$0xff] }
 0x454   : > { %v761_v15 = vsub.f32 %v753_v52, %v757_v14 }
 0x456   : > { %v1639_v16 = vpop.eup %1638  ;;  %v763_v17 = vmul.f32 1.442695, %v761_v15 }
 0x457   : > { %v1641_v18 = vpop.eup %1640  ;;  %v770_v19 = vsel %vm673_vm11, %v1639_v16, 0.0 }
 0x458   : > { %1642 = vpow2.f32 %v763_v17  ;;  %771 = vadd.xlane.f32.xlu0 %v770_v19  ;;  %v948_v20 = vsel %vm673_vm11, %v1641_v18, 0.0  ;;  %v951_v30 = vpack.c.bf16 %v1641_v18, %v1635_v5  ;;  %v1618_v18 = vld [vmem:[%s2166_s12] ss:$0 sm:$0xff] }
 0x459   : > { %949 = vadd.xlane.f32.xlu2 %v948_v20 }
 0x45e   : > { %v1643_v21 = vpop.eup %1642  ;;  %v953_v22 = vpop.permute.xlu0 %952 }
 0x45f   : > { %v773_v23 = vpack.c.bf16 %v1639_v16, %v1643_v21  ;;  %965 = vmatpush.bf16.msrb.mxu2 %v953_v22  ;;  %v767_v27 = vsel %vm673_vm11, %v1643_v21, 0.0  ;;  %v1617_v16 = vld [vmem:[%s2160_s6] ss:$0 sm:$0xff] }
 0x460   : > { %v993_v17 = vadd.f32 %v1617_v16, %v1932_v0 }
 0x461   : > { %687 = vadd.xlane.f32.xlu2 %v686_v24  ;;  %1434 = vmatmul.msk.bf16.vlgmr.msra.gmra.mxu2 %vm673_vm11, %v773_v23  ;;  %v994_v23 = vadd.f32 %v1617_v16, %v1936_v2 }
 0x469   : > { %768 = vadd.xlane.f32.xlu2 %v767_v27 }
 0x46b   : > { %v864_v28 = vpop.permute.xlu1 %863 }
 0x46c   : > { %876 = vmatpush.bf16.msrb.mxu1 %v864_v28 }
 0x46f   : > { %1440 = vmatmul.msk.bf16.vlgmr.msrb.gmra.mxu1 %vm673_vm11, %v862_v29 }
 0x471   : > { %690 = vadd.xlane.f32.xlu2 %v689_v31  ;;  %1446 = vmatmul.msk.bf16.vlgmr.msrb.gmra.mxu2 %vm673_vm11, %v951_v30 }
 0x4bb   : > { %v858_v32 = vpop.xlane.xlu2 %857 }
 0x4c1   : > { %v947_v45 = vpop.xlane.xlu1 %946 }
 0x4c3   : > { %v861_v25 = vpop.xlane.xlu2 %860 }
 0x4cb   : > { %v772_v53 = vpop.xlane.xlu0 %771 }
 0x4cc   : > { %v950_v33 = vpop.xlane.xlu2 %949 }
 0x4d4   : > { %v688_v36 = vpop.xlane.xlu2 %687 }
 0x4d5   : > { %1644 = vrcp.f32 %v688_v36 }
 0x4db   : > { %v1645_v37 = vpop.eup %1644 }
 0x4dc   : > { %v715_v38 = vmul.f32 %v1645_v37, %v2001_v34  ;;  %v769_v39 = vpop.xlane.xlu2 %768 }
 0x4dd   : > { %1646 = vrcp.f32 %v769_v39 }
 0x4de   : > { %v717_v40 = vpack.c.bf16 %v715_v38, %v715_v38 }
 0x4e0   : > { %720 = vst.msk [vmem:[#allocation3] sm:$0xf] %vm719_vm13, %v717_v40 }
 0x4e3   : > { %v1647_v41 = vpop.eup %1646 }
 0x4e4   : > { %v691_v42 = vpop.xlane.xlu2 %690  ;;  %v789_v26 = vpop.f32.mrf.mxu2 }
 0x4e5   : > { %1648 = vrcp.f32 %v691_v42  ;;  %v796_v43 = vmul.f32 %v1647_v41, %v789_v26  ;;  %v1522_v42 = vld [vmem:[%s2163_s9 + $0x8] sm:$0xff] }
 0x4e6   : > { %1650 = vrcp.f32 %v858_v32  ;;  %1143 = vmatpush.bf16.msra.mxu1 %v1522_v42 }
 0x4e7   : > { %v798_v44 = vpack.c.bf16 %v796_v43, %v796_v43  ;;  %1652 = vrcp.f32 %v947_v45 }
 0x4e8   : > { %1654 = vrcp.f32 %v861_v25 }
 0x4e9   : > { %802 = vrot.lane.b32.xlu2 %v798_v44, %s2170_s16  ;;  %1656 = vrcp.f32 %v772_v53  ;;  %v1521_v44 = vld [vmem:[%s2163_s9] sm:$0xff] }
 0x4ea   : > { %1658 = vrcp.f32 %v950_v33  ;;  %1144 = vmatpush.bf16.msra.mxu1 %v1521_v44 }
 0x4eb   : > { %v1649_v46 = vpop.eup %1648 }
 0x4ec   : > { %v1651_v47 = vpop.eup %1650  ;;  %v716_v34 = vmul.f32 %v1649_v46, %v2003_v35  ;;  %v791_v48 = vpop.f32.mrf.mxu2 }
 0x4ed   : > { %v878_v49 = vpop.f32.mrf.mxu1  ;;  %v1653_v54 = vpop.eup %1652 }
 0x4ee   : > { %v885_v50 = vmul.f32 %v1651_v47, %v878_v49  ;;  %v718_v51 = vpack.c.bf16 %v716_v34, %v716_v34  ;;  %v1655_v55 = vpop.eup %1654 }
 0x4ef   : > { %v1657_v62 = vpop.eup %1656 }
 0x4f0   : > { %v887_v52 = vpack.c.bf16 %v885_v50, %v885_v50  ;;  %721 = vst.msk [vmem:[#allocation3 + $0x4] sm:$0xf] %vm719_vm13, %v718_v51  ;;  %v797_v63 = vmul.f32 %v1657_v62, %v791_v48  ;;  %v1659_v61 = vpop.eup %1658 }
 0x4f2   : > { %891 = vrot.lane.b32.xlu1 %v887_v52, %s1796_s23  ;;  %v799_v1 = vpack.c.bf16 %v797_v63, %v797_v63 }
 0x4f4   : > { %v967_v57 = vpop.f32.mrf.mxu2 }
 0x4f5   : > { %v880_v56 = vpop.f32.mrf.mxu1  ;;  %v974_v59 = vmul.f32 %v1653_v54, %v967_v57 }
 0x4f6   : > { %v886_v58 = vmul.f32 %v1655_v55, %v880_v56  ;;  %v1620_v55 = vld [vmem:[%s2162_s8] ss:$0 sm:$0xff] }
 0x4f7   : > { %v976_v60 = vpack.c.bf16 %v974_v59, %v974_v59 }
 0x4f8   : > { %v888_v35 = vpack.c.bf16 %v886_v58, %v886_v58 }
 0x4f9   : > { %980 = vrot.lane.b32.xlu2 %v976_v60, %s1797_s24 }
 0x4fa   : > { %893 = vrot.lane.b32.xlu0 %v888_v35, %s1796_s23  ;;  %s1276_s23 = sshll.u32 %s1273_s14, 4  ;;  %s1277_s23 = int_to_ptr.hbm [resolvable:$true] %s1276_s23 }
 0x4fc   : > { %v969_v3 = vpop.f32.mrf.mxu2 }
 0x4fd   : > { %v975_v4 = vmul.f32 %v1659_v61, %v969_v3 }
 0x4ff   : > { %v977_v5 = vpack.c.bf16 %v975_v4, %v975_v4 }
 0x502   : > { %804 = vrot.lane.b32.xlu0 %v799_v1, %s2170_s16  ;;  %s1411_s16 = sshll.u32 %s499_s0, 4 }
 0x503   : > { %s501_s22 = scalar_lea.vmem [#allocation9], %s1411_s16  ;;  %s1718_s16 = scalar_lea.hbm %s2167_s13, 32 }
 0x504   : > { %s1274_s25 = sshll.u32 %s501_s22, 4  ;;  %s1275_s25 = int_to_ptr.vmem [resolvable:$true] %s1274_s25 }
 0x50a   : > { %982 = vrot.lane.b32.xlu0 %v977_v5, %s1797_s24  ;;  %s1712_s24 = sshra.s32 %s1277_s23, 4  ;;  %s1713_s24 = int_to_ptr.hbm [resolvable:$true] %s1712_s24 }
 0x50b   : > { %s1714_s1 = scalar_lea.hbm %s1713_s24, 16  ;;  %p1719_p5 = scmp.lt.s32.totalorder %s1713_s24, %s2167_s13 }
 0x50c   : > { %p1715_p1 = scmp.ne.s32.totalorder %s1713_s24, %s1714_s1  ;;  %p1720_p6 = scmp.lt.s32.totalorder %s1718_s16, %s1714_s1 }
 0x50e   : > { %p1716_p2 = pnand %p1715_p1, %p1909_p4  ;;  %p1721_p7 = por %p1720_p6, %p1719_p5 }
 0x510   : > { %p1717_p3 = pneg %p1716_p2 }
 0x512   : > { %p1722_p9 = pnand %p1721_p7, %p1717_p3 }
 0x543   : > { %v803_v6 = vpop.permute.xlu2 %802 }
 0x544   : > { %809 = vst.msk [vmem:[#allocation3] sm:$0xf] %vm808_vm14, %v803_v6  ;;  %v1530_v6 = vld [vmem:[%s2165_s11 + $0x38] sm:$0xff] }
 0x545   : > { %1236 = vmatpush.bf16.msrb.mxu3 %v1530_v6 }
 0x549   : > { %1237 = vmatpush.bf16.msrb.mxu3 %v1529_v7 }
 0x54d   : > { %1238 = vmatpush.bf16.msrb.mxu3 %v1528_v8 }
 0x553   : > { %v981_v11 = vpop.permute.xlu2 %980 }
 0x564   : > { %v892_v9 = vpop.permute.xlu1 %891 }
 0x565   : > { %898 = vst.msk [vmem:[#allocation3] sm:$0xf] %vm897_vm15, %v892_v9  ;;  %v1527_v9 = vld [vmem:[%s2165_s11 + $0x20] sm:$0xff] }
 0x566   : > { %987 = vst.msk [vmem:[#allocation3] sm:$0xf] %vm986_vm1, %v981_v11  ;;  %1239 = vmatpush.bf16.msrb.mxu3 %v1527_v9  ;;  %v1526_v11 = vld [vmem:[%s2165_s11 + $0x18] sm:$0xff] }
 0x56a   : > { %1240 = vmatpush.bf16.msrb.mxu3 %v1526_v11 }
 0x56c   : > { %v894_v12 = vpop.permute.xlu0 %893 }
 0x574   : > { %v805_v13 = vpop.permute.xlu0 %804 }
 0x575   : > { %810 = vst.msk [vmem:[#allocation3 + $0x4] sm:$0xf] %vm808_vm14, %v805_v13  ;;  %v1524_v13 = vld [vmem:[%s2165_s11 + $0x8] sm:$0xff] }
 0x576   : > { %899 = vst.msk [vmem:[#allocation3 + $0x4] sm:$0xf] %vm897_vm15, %v894_v12  ;;  %v1525_v12 = vld [vmem:[%s2165_s11 + $0x10] sm:$0xff] }
 0x577   : > { %1241 = vmatpush.bf16.msrb.mxu3 %v1525_v12 }
 0x57b   : > { %1242 = vmatpush.bf16.msrb.mxu3 %v1524_v13 }
 0x57c   : > { %v983_v14 = vpop.permute.xlu0 %982 }
 0x57d   : > { %988 = vst.msk [vmem:[#allocation3 + $0x4] sm:$0xf] %vm986_vm1, %v983_v14  ;;  %v1523_v14 = vld [vmem:[%s2165_s11] sm:$0xff] }
 0x57f   : > { %1243 = vmatpush.bf16.msrb.mxu3 %v1523_v14 }
 0x584   : > { %v1517_v15 = vld [vmem:[#allocation3] sm:$0xff] }
 0x585   : > { %1459 = vmatmul.msk.bf16.vlgmr.msra.gmra.mxu0 %vm529_vm0, %v1517_v15  ;;  %v1621_v15 = vld [vmem:[%s2164_s10] ss:$0 sm:$0xff] }
 0x602   : > { %v1030_v19 = vpop.f32.mrf.mxu0 }
 0x603   : > { %v1035_v20 = vadd.f32 %v1030_v19, %v993_v17 }
 0x605   : > { %v1102_v21 = vadd.f32 %v1618_v18, %v1035_v20  ;;  %v1039_v22 = vsel %vm529_vm0, %v1035_v20, 0.0 }
 0x606   : > { %1040 = vadd.xlane.f32.xlu2 %v1039_v22 }
 0x607   : > { %1104 = vst.msk [vmem:[#allocation5] sm:$0xff] %vm529_vm0, %v1102_v21 }
 0x60a   : > { %v1032_v24 = vpop.f32.mrf.mxu0 }
 0x60b   : > { %v1036_v27 = vadd.f32 %v1032_v24, %v994_v23 }
 0x60d   : > { %v1103_v28 = vadd.f32 %v1618_v18, %v1036_v27  ;;  %v1042_v29 = vsel %vm529_vm0, %v1036_v27, 0.0 }
 0x60e   : > { %1043 = vadd.xlane.f32.xlu1 %v1042_v29 }
 0x60f   : > { %1105 = vst.msk [vmem:[#allocation5 + $0x8] sm:$0xff] %vm529_vm0, %v1103_v28 }
 0x679   : > { %v1041_v0 = vpop.xlane.xlu2 %1040 }
 0x67a   : > { %v1045_v30 = vmul.f32 %v1041_v0, %v1940_v10 }
 0x67c   : > { %v1047_v31 = vsub.f32 %v1035_v20, %v1045_v30 }
 0x67e   : > { %v1049_v32 = vmul.f32 %v1047_v31, %v1047_v31 }
 0x680   : > { %v1051_v25 = vsel %vm529_vm0, %v1049_v32, 0.0 }
 0x681   : > { %1052 = vadd.xlane.f32.xlu0 %v1051_v25  ;;  %v1044_v33 = vpop.xlane.xlu1 %1043 }
 0x682   : > { %v1046_v36 = vmul.f32 %v1044_v33, %v1940_v10 }
 0x684   : > { %v1048_v2 = vsub.f32 %v1036_v27, %v1046_v36 }
 0x686   : > { %v1050_v37 = vmul.f32 %v1048_v2, %v1048_v2 }
 0x688   : > { %v1054_v38 = vsel %vm529_vm0, %v1050_v37, 0.0 }
 0x689   : > { %1055 = vadd.xlane.f32.xlu2 %v1054_v38 }
 0x6f4   : > { %v1053_v39 = vpop.xlane.xlu0 %1052 }
 0x6f5   : > { %v1057_v40 = vmul.f32 %v1053_v39, %v1940_v10 }
 0x6f7   : > { %v1059_v41 = vadd.f32 1e-05, %v1057_v40  ;;  %v1169_v40 = vld [vmem:[#allocation5] sm:$0xff] }
 0x6f9   : > { %1660 = vrsqrt.f32 %v1059_v41  ;;  %vm1067_vm3 = vweird.f32 %v1059_v41 }
 0x6fc   : > { %v1056_v26 = vpop.xlane.xlu2 %1055 }
 0x6fd   : > { %v1058_v43 = vmul.f32 %v1056_v26, %v1940_v10  ;;  %v1619_v10 = vld [vmem:[%s2161_s7] ss:$0 sm:$0xff] }
 0x6fe   : > { %v1170_v26 = vld [vmem:[#allocation5 + $0x8] sm:$0xff] }
 0x6ff   : > { %v1661_v45 = vpop.eup %1660  ;;  %v1060_v46 = vadd.f32 1e-05, %v1058_v43 }
 0x700   : > { %v1062_v47 = vmul.f32 %v1661_v45, %v1059_v41  ;;  %vm1068_vm2 = vweird.f32 %v1661_v45 }
 0x701   : > { %1662 = vrsqrt.f32 %v1060_v46  ;;  %vm1069_vm4 = vmor %vm1067_vm3, %vm1068_vm2  ;;  %vm1077_vm7 = vweird.f32 %v1060_v46 }
 0x702   : > { %v1063_v34 = vmul.f32 %v1661_v45, %v1062_v47 }
 0x704   : > { %v1064_v48 = vmul.f32 0.5, %v1063_v34 }
 0x706   : > { %v1065_v49 = vsub.f32 1.5, %v1064_v48 }
 0x707   : > { %v1663_v50 = vpop.eup %1662 }
 0x708   : > { %v1066_v51 = vmul.f32 %v1661_v45, %v1065_v49  ;;  %v1072_v52 = vmul.f32 %v1663_v50, %v1060_v46  ;;  %vm1078_vm5 = vweird.f32 %v1663_v50 }
 0x709   : > { %vm1079_vm8 = vmor %vm1077_vm7, %vm1078_vm5 }
 0x70a   : > { %v1070_v53 = vsel %vm1069_vm4, %v1661_v45, %v1066_v51  ;;  %v1073_v54 = vmul.f32 %v1663_v50, %v1072_v52 }
 0x70b   : > { %v1081_v56 = vmul.f32 %v1070_v53, %v1047_v31 }
 0x70c   : > { %v1074_v57 = vmul.f32 0.5, %v1073_v54 }
 0x70d   : > { %v1086_v58 = vmul.f32 %v1619_v10, %v1081_v56 }
 0x70e   : > { %v1075_v59 = vsub.f32 1.5, %v1074_v57 }
 0x70f   : > { %v1091_v35 = vadd.f32 %v1620_v55, %v1086_v58 }
 0x710   : > { %v1076_v60 = vmul.f32 %v1663_v50, %v1075_v59 }
 0x711   : > { %v1093_v62 = vpack.c.bf16 %v1091_v35, %v1091_v35 }
 0x712   : > { %v1080_v63 = vsel %vm1079_vm8, %v1663_v50, %v1076_v60 }
 0x713   : > { %1096 = vst.msk [vmem:[#allocation4] sm:$0xf] %vm1095_vm6, %v1093_v62  ;;  %v1082_v1 = vmul.f32 %v1080_v63, %v1048_v2 }
 0x715   : > { %v1087_v3 = vmul.f32 %v1619_v10, %v1082_v1 }
 0x717   : > { %v1092_v61 = vadd.f32 %v1620_v55, %v1087_v3 }
 0x719   : > { %v1094_v4 = vpack.c.bf16 %v1092_v61, %v1092_v61 }
 0x71b   : > { %1097 = vst.msk [vmem:[#allocation4 + $0x4] sm:$0xf] %vm1095_vm6, %v1094_v4 }
 0x722   : > { %v1520_v5 = vld [vmem:[#allocation4] sm:$0xff] }
 0x723   : > { %1472 = vmatmul.msk.bf16.vlgmr.msra.gmra.mxu1 %vm529_vm0, %v1520_v5 }
 0x7a0   : > { %v1146_v16 = vpop.f32.mrf.mxu1 }
 0x7a1   : > { %v1147_v17 = vadd.f32 %v1621_v15, %v1146_v16 }
 0x7a3   : > { %v1153_v18 = vmul.f32 0.044715, %v1147_v17  ;;  %v1151_v33 = vmul.f32 0.5, %v1147_v17 }
 0x7a5   : > { %v1155_v19 = vmul.f32 %v1153_v18, %v1147_v17 }
 0x7a7   : > { %v1157_v20 = vmul.f32 %v1155_v19, %v1147_v17 }
 0x7a8   : > { %v1148_v21 = vpop.f32.mrf.mxu1 }
 0x7a9   : > { %v1149_v22 = vadd.f32 %v1621_v15, %v1148_v21  ;;  %v1159_v23 = vadd.f32 %v1157_v20, %v1147_v17 }
 0x7ab   : > { %v1154_v24 = vmul.f32 0.044715, %v1149_v22  ;;  %v1161_v28 = vmul.f32 0.7978846, %v1159_v23  ;;  %v1152_v36 = vmul.f32 0.5, %v1149_v22 }
 0x7ad   : > { %v1156_v27 = vmul.f32 %v1154_v24, %v1149_v22  ;;  %1664 = vtanh.f32 %v1161_v28 }
 0x7af   : > { %v1158_v29 = vmul.f32 %v1156_v27, %v1149_v22 }
 0x7b1   : > { %v1160_v0 = vadd.f32 %v1158_v29, %v1149_v22 }
 0x7b3   : > { %v1162_v30 = vmul.f32 0.7978846, %v1160_v0  ;;  %v1665_v31 = vpop.eup %1664 }
 0x7b4   : > { %v1165_v32 = vadd.f32 1.0, %v1665_v31 }
 0x7b5   : > { %1666 = vtanh.f32 %v1162_v30 }
 0x7b6   : > { %v1167_v37 = vmul.f32 %v1165_v32, %v1151_v33 }
 0x7bb   : > { %v1667_v25 = vpop.eup %1666 }
 0x7bc   : > { %v1166_v2 = vadd.f32 1.0, %v1667_v25 }
 0x7be   : > { %v1168_v38 = vmul.f32 %v1166_v2, %v1152_v36 }
 0x7c0   : > { %v1171_v39 = vpack.c.bf16 %v1168_v38, %v1167_v37 }
 0x7c2   : > { %1244 = vmatmul.bf16.vlgmr.msrb.gmra.mxu3 %v1171_v39 }
 0x845   : > { %v1245_v41 = vpop.f32.mrf.mxu3 }
 0x846   : > { %v1250_v42 = vadd.f32 %v1245_v41, %v1169_v40 }
 0x848   : > { %1252 = vst.msk [vmem:[#allocation5] sm:$0xff] %vm529_vm0, %v1250_v42 }
 0x84d   : > { %v1247_v43 = vpop.f32.mrf.mxu3 }
 0x84e   : > { %v1251_v44 = vadd.f32 %v1247_v43, %v1170_v26 }
 0x84f   : > { %v1257_v45 = vld [vmem:[#allocation5] sm:$0xff] }
 0x850   : > { %1253 = vst.msk [vmem:[#allocation5 + $0x8] sm:$0xff] %vm529_vm0, %v1251_v44 }
 0x851   : > { %1259 = vst.msk [vmem:[%s501_s22] sm:$0xff] %vm529_vm0, %v1257_v45 }
 0x857   : > { %v1258_v46 = vld [vmem:[#allocation5 + $0x8] sm:$0xff] }
 0x858   : > { %1260 = vst.msk [vmem:[%s501_s22 + $0x8] sm:$0xff] %vm529_vm0, %v1258_v46 }
 0x859   : > { %1725 = shalt.err (!%p1722_p9)
}
 0x85a   : > { %s1798_s0 = smov 128   ;;  %s2181_s14 = smov 8  }
 0x85b   : > { %1536 = dma.vmem_to_hbm [thread:$0]  (%p1909_p4), %s1275_s25, 256, %s1277_s23, %s1262_s28, %s1798_s0, %s1798_s0, %s2181_s14  }
 0x85c PF: > { %s2182_s22 = sld [smem:[#allocation12_spill]]  ;;  %p1548_p10 = scmp.ge.s32.totalorder %s1780_s30, 2 }
 0x85e   : > { %p1543_p11 = pnand %p1548_p10, %p1916_p8 }
 0x860   : > { %p1544_p12 = pneg %p1543_p11 }
 0x862   : > { %s1291_s17 = sand.u32 1, %s2182_s22  }
 0x863   : > { %s1292_s2 = scalar_lea.sflag [#allocation8], %s1291_s17 }
 0x864   : > { %1755 = dma.done.wait (%p1544_p12), %s1292_s2, 256  }
 0x865   : > { %1757 = vsyncadd (%p1544_p12), %s1292_s2, 4294967040  ;;  %s27_s30 = sadd.s32 1, %s1780_s30   ;;  %s2183_s1 = sld [smem:[#allocation13_spill]] }
 0x866   : > { %p24_p13 = scmp.ge.s32.totalorder %s27_s30, 4   ;;  %s2184_s25 = smov %s1764_s26 }
 0x867   : > { %s2185_s26 = smov %s1768_s27  ;;  %s2186_s27 = smov %s1922_s21 }
 0x868   : > { %s2187_s28 = smov %s1776_s29  ;;  %26 = sbr.rel (!%p24_p13) target bundleno = 9 (0x9), region = 129 }
 0x86b   : > { %s2188_s29 = smov %s2183_s1 }
 0x86d   :  { %1298 = vsyncpa [#allocation7], 1 }
 0x86e   :  { %1300 = vsyncpa [#allocation7 + $0x1], 1 }
 0x86f   :  { %1301 = vsyncpa [#allocation8], 1 }
 0x870   :  { %1303 = vsyncpa [#allocation8 + $0x1], 1 }

</bundles_post_ra>
